<compile_context>
chip_gen: v5e
topology: v5e:2x2
jax: 0.10.0
libtpu: 0.0.40
codegen_flags: <defaults>
</compile_context>

<pallas_src>
import jax
import jax.numpy as jnp
from jax import lax
from jax.experimental import pallas as pl
from jax.experimental.pallas import tpu as pltpu


# ----------------------------------------------------------------------------
# Kernel
# ----------------------------------------------------------------------------
def _bottleneck_kernel(x_ref, halo_ref, w1_ref, b1_ref, w2_ref, b2_ref,
                       w3_ref, b3_ref, o_ref, h1_ref):
    """One (batch, row-tile) block of the fused Bottleneck.

    x_ref   : (1, TH, W, Cin)   bf16  pipelined input tile (also the residual)
    halo_ref: (1, 2, W, Cin)    bf16  top / bottom halo rows for this tile
    w1_ref  : (Cin,  Cmid)      bf16  conv1 weight, bn1 scale folded in
    w2_ref  : (9*Cmid, Cmid)    bf16  conv2 taps flattened (dy,dx,cin), bn2 folded
    w3_ref  : (Cmid, Cin)       bf16  conv3 weight, bn3 scale folded in
    b*_ref  : (1, C)            f32   folded BatchNorm biases
    h1_ref  : (TH+2, W, Cmid)   bf16  VMEM scratch for the conv1 activation slab
    """
    TH, W, Cin = x_ref.shape[1], x_ref.shape[2], x_ref.shape[3]
    Cmid = w1_ref.shape[1]

    i = pl.program_id(1)
    n_tiles = pl.num_programs(1)

    x = x_ref[0]                                   # (TH, W, Cin) bf16
    xf = x.reshape(TH * W, Cin)

    # --- conv1 (1x1) + bn1 bias + relu on the main rows --> scratch rows 1..TH
    h1m = jnp.dot(xf, w1_ref[...], preferred_element_type=jnp.float32)
    h1m = jnp.maximum(h1m + b1_ref[...], 0.0)
    h1_ref[pl.ds(1, TH)] = h1m.reshape(TH, W, Cmid).astype(jnp.bfloat16)

    # --- conv1 on the two halo rows; rows outside the image are zeroed so the
    # 3x3 conv sees exact zero-padding of the *post-ReLU* activation.
    halo = halo_ref[0]                             # (2, W, Cin) bf16
    h1h = jnp.dot(halo.reshape(2 * W, Cin), w1_ref[...],
                  preferred_element_type=jnp.float32)
    h1h = jnp.maximum(h1h + b1_ref[...], 0.0).reshape(2, W, Cmid)
    top_ok = (i > 0).astype(jnp.float32)
    bot_ok = (i < n_tiles - 1).astype(jnp.float32)
    h1_ref[0] = (h1h[0] * top_ok).astype(jnp.bfloat16)
    h1_ref[TH + 1] = (h1h[1] * bot_ok).astype(jnp.bfloat16)

    # --- conv2 (3x3, stride 1, pad 1): one column-shifted bf16 slab of shape
    # (TH+2, W, 3*Cmid), then 3 accumulating matmuls (one per row offset dy).
    h1 = h1_ref[...]                               # (TH+2, W, Cmid) bf16
    zcol = jnp.zeros((TH + 2, 1, Cmid), jnp.bfloat16)
    left = jnp.concatenate([zcol, h1[:, :W - 1, :]], axis=1)   # column x-1 tap
    right = jnp.concatenate([h1[:, 1:, :], zcol], axis=1)      # column x+1 tap
    slab = jnp.concatenate([left, h1, right], axis=-1)         # (TH+2, W, 3*Cmid)
    slab = slab.reshape((TH + 2) * W, 3 * Cmid)

    K = 3 * Cmid
    h2 = jnp.dot(slab[0:TH * W], w2_ref[0:K, :],
                 preferred_element_type=jnp.float32)
    h2 = h2 + jnp.dot(slab[W:W + TH * W], w2_ref[K:2 * K, :],
                      preferred_element_type=jnp.float32)
    h2 = h2 + jnp.dot(slab[2 * W:2 * W + TH * W], w2_ref[2 * K:3 * K, :],
                      preferred_element_type=jnp.float32)
    h2 = jnp.maximum(h2 + b2_ref[...], 0.0)

    # --- conv3 (1x1) + bn3 bias + residual add + relu -------------------------
    h3 = jnp.dot(h2.astype(jnp.bfloat16), w3_ref[...],
                 preferred_element_type=jnp.float32)
    h3 = h3 + b3_ref[...]
    out = jnp.maximum(h3 + xf.astype(jnp.float32), 0.0)
    o_ref[...] = out.reshape(1, TH, W, Cin).astype(o_ref.dtype)


# ----------------------------------------------------------------------------
# Tiling helpers (generation-aware VMEM budget)
# ----------------------------------------------------------------------------
def _vmem_budget():
    cap = 64 * 1024 * 1024                    # conservative (v7x per-TC) fallback
    try:
        info = pltpu.get_tpu_info()
        cap = int(getattr(info, "vmem_capacity_bytes", cap))
    except Exception:
        pass
    budget = int(cap * 0.30)                  # working-set target (keeps slack)
    limit = min(int(cap * 0.75), 100 * 1024 * 1024)
    return budget, limit


def _vmem_bytes_estimate(th, w, cin, cmid):
    bf16, f32 = 2, 4
    lp = lambda c: -(-c // 128) * 128          # lane padding
    wp = -(-w // 16) * 16                      # sublane padding (bf16 packing)
    cin_p, cmid_p = lp(cin), lp(cmid)
    pipelined = 2 * (th * wp * cin_p + 2 * wp * cin_p + th * wp * cin_p) * bf16
    weights = (cin * cmid_p + 9 * cmid * cmid_p + cmid * cin_p) * bf16 \
              + (2 * cmid_p + cin_p) * f32
    h1 = (th + 2) * wp * cmid_p * bf16
    slab = (th + 2) * wp * lp(3 * cmid) * bf16
    temps = th * wp * (2 * cmid_p + 2 * cin_p) * f32
    return pipelined + weights + h1 + slab + temps


def _pick_row_tile(h, w, cin, cmid, budget_bytes):
    """Largest divisor of H whose estimated working set fits the budget."""
    best = 1
    for th in range(1, h + 1):
        if h % th == 0 and _vmem_bytes_estimate(th, w, cin, cmid) <= budget_bytes:
            best = th
    return best


# ----------------------------------------------------------------------------
# Wrappers
# ----------------------------------------------------------------------------
def bottleneck_pallas_nhwc(x, kparams, *, row_tile=None):
    """x: (N, H, W, Cin) NHWC (any float dtype).  kparams from prepare_params()."""
    N, H, W, Cin = x.shape
    w1f, b1, w2f, b2, w3f, b3 = kparams
    Cmid = w1f.shape[1]
    assert w3f.shape == (Cmid, Cin), "downsample=None requires Cin == 4*Cmid"

    budget, vmem_limit = _vmem_budget()
    if row_tile is None:
        row_tile = _pick_row_tile(H, W, Cin, Cmid, budget)
    TH = row_tile
    assert H % TH == 0, "row_tile must divide H"
    n_tiles = H // TH
    grid = (N, n_tiles)          # N * n_tiles >= 2 keeps both v7x TCs busy

    x_bf = x.astype(jnp.bfloat16)

    # Halo rows per tile, gathered once in the wrapper (clamped indices; the
    # kernel zeroes the post-conv1 activation for rows outside the image).
    tiles = jnp.arange(n_tiles)
    top_idx = jnp.maximum(tiles * TH - 1, 0)
    bot_idx = jnp.minimum((tiles + 1) * TH, H - 1)
    halos = jnp.stack([x_bf[:, top_idx], x_bf[:, bot_idx]], axis=2)
    halos = halos.reshape(N, 2 * n_tiles, W, Cin)          # (N, 2*n_tiles, W, Cin)

    def xo_map(n, i):
        return (n, i, 0, 0)

    def halo_map(n, i):
        return (n, i, 0, 0)

    def const2(n, i):
        return (0, 0)

    return pl.pallas_call(
        _bottleneck_kernel,
        out_shape=jax.ShapeDtypeStruct((N, H, W, Cin), jnp.bfloat16),
        grid_spec=pltpu.PrefetchScalarGridSpec(
            num_scalar_prefetch=0,
            grid=grid,
            in_specs=[
                pl.BlockSpec((1, TH, W, Cin), xo_map),     # x tile (pipelined, bf16)
                pl.BlockSpec((1, 2, W, Cin), halo_map),    # halo rows (pipelined)
                pl.BlockSpec((Cin, Cmid), const2),         # w1 (bn1 folded)
                pl.BlockSpec((1, Cmid), const2),           # b1
                pl.BlockSpec((9 * Cmid, Cmid), const2),    # w2 flat (bn2 folded)
                pl.BlockSpec((1, Cmid), const2),           # b2
                pl.BlockSpec((Cmid, Cin), const2),         # w3 (bn3 folded)
                pl.BlockSpec((1, Cin), const2),            # b3
            ],
            out_specs=pl.BlockSpec((1, TH, W, Cin), xo_map),
            scratch_shapes=[
                pltpu.VMEM((TH + 2, W, Cmid), jnp.bfloat16),   # conv1 slab
            ],
        ),
        compiler_params=pltpu.CompilerParams(
            dimension_semantics=("parallel", "parallel"),
            vmem_limit_bytes=vmem_limit,
        ),
    )(x_bf, halos, w1f, b1, w2f, b2, w3f, b3)


def bottleneck_pallas(x_nchw, raw_params, *, row_tile=None):
    """PyTorch-compatible entry: (N, Cin, H, W) f32 in / out.

    NOTE: the NCHW<->NHWC transposes here are boundary-only for parity with
    the nn.Module; in an NHWC network call bottleneck_pallas_nhwc directly
    and keep the whole network channels-last + bf16 (no transposes/upcasts on
    the hot path).
    """
    kparams = prepare_params(raw_params)
    x = jnp.transpose(x_nchw, (0, 2, 3, 1))
    y = bottleneck_pallas_nhwc(x, kparams, row_tile=row_tile)
    return jnp.transpose(y, (0, 3, 1, 2)).astype(x_nchw.dtype)


# ----------------------------------------------------------------------------
# Parameter construction / folding
# ----------------------------------------------------------------------------
def _fold_bn(gamma, beta, mean, var, eps=1e-5):
    scale = gamma * lax.rsqrt(var + eps)
    bias = beta - mean * scale
    return scale, bias


def prepare_params(raw_params):
    """Fold inference BatchNorm scales into conv weights; cast weights bf16."""
    w1, bn1, w2, bn2, w3, bn3 = raw_params
    Cmid = w1.shape[1]
    s1, b1 = _fold_bn(*bn1)
    s2, b2 = _fold_bn(*bn2)
    s3, b3 = _fold_bn(*bn3)
    w1f = (w1 * s1[None, :]).astype(jnp.bfloat16)
    w2f = (w2 * s2[None, None, None, :]).reshape(9 * Cmid, Cmid).astype(jnp.bfloat16)
    w3f = (w3 * s3[None, :]).astype(jnp.bfloat16)
    return (w1f, b1.reshape(1, -1).astype(jnp.float32),
            w2f, b2.reshape(1, -1).astype(jnp.float32),
            w3f, b3.reshape(1, -1).astype(jnp.float32))


def make_params(key, in_channel, out_channel):
    """Deterministic synthetic weights (shapes per Bottleneck.__init__)."""
    Cmid = out_channel
    Cout = out_channel * 4
    assert Cout == in_channel, "downsample=None requires in_channel == 4*out_channel"
    ks = jax.random.split(key, 6)

    w1 = 0.1 * jax.random.normal(ks[0], (in_channel, Cmid), jnp.float32)
    w2 = 0.1 * jax.random.normal(ks[1], (3, 3, Cmid, Cmid), jnp.float32)
    w3 = 0.1 * jax.random.normal(ks[2], (Cmid, Cout), jnp.float32)

    def bn(k, c):
        kg, kb, km, kv = jax.random.split(k, 4)
        gamma = 0.5 + jax.random.uniform(kg, (c,), jnp.float32)
        beta = 0.1 * jax.random.normal(kb, (c,), jnp.float32)
        mean = 0.1 * jax.random.normal(km, (c,), jnp.float32)
        var = 0.5 + jax.random.uniform(kv, (c,), jnp.float32)
        return (gamma, beta, mean, var)

    return (w1, bn(ks[3], Cmid), w2, bn(ks[4], Cmid), w3, bn(ks[5], Cout))


# ----------------------------------------------------------------------------
# Plain-JAX reference (f32, NCHW convs) for correctness check
# ----------------------------------------------------------------------------
def bottleneck_ref(x_nchw, raw_params):
    w1, bn1, w2, bn2, w3, bn3 = raw_params

    def conv1x1(x, w_io):
        w = jnp.transpose(w_io, (1, 0))[:, :, None, None]      # OIHW
        return lax.conv_general_dilated(x, w, (1, 1), "VALID",
                                        dimension_numbers=("NCHW", "OIHW", "NCHW"))

    def conv3x3(x, w_hwio):
        w = jnp.transpose(w_hwio, (3, 2, 0, 1))                 # OIHW
        return lax.conv_general_dilated(x, w, (1, 1), ((1, 1), (1, 1)),
                                        dimension_numbers=("NCHW", "OIHW", "NCHW"))

    def bn(x, p):
        g, b, m, v = p
        s = g / jnp.sqrt(v + 1e-5)
        return x * s.reshape(1, -1, 1, 1) + (b - m * s).reshape(1, -1, 1, 1)

    out = jax.nn.relu(bn(conv1x1(x_nchw, w1), bn1))
    out = jax.nn.relu(bn(conv3x3(out, w2), bn2))
    out = bn(conv1x1(out, w3), bn3)
    return jax.nn.relu(out + x_nchw)


# ----------------------------------------------------------------------------
if __name__ == "__main__":
    key = jax.random.PRNGKey(0)
    k_x, k_p = jax.random.split(key)

    # Bottleneck(in_channel=128, out_channel=32): lane-dense Cin=128 blocks.
    # H=16 with row_tile=8 -> 2 row tiles per image, exercising the halo path
    # (interior seam, top border, bottom border) and a 4-way parallel grid.
    N, Cin, H, W = 2, 128, 16, 16
    Cmid = Cin // 4

    x = jax.random.normal(k_x, (N, Cin, H, W), jnp.float32)
    raw_params = make_params(k_p, Cin, Cmid)

    y = bottleneck_pallas(x, raw_params, row_tile=8)
    jax.block_until_ready(y)

    y_ref = bottleneck_ref(x, raw_params)
    assert y.shape == (N, Cin, H, W)
    # bf16 I/O + bf16 MXU matmuls (f32 accumulation) -> loose tolerance.
    max_err = float(jnp.max(jnp.abs(y - y_ref)))
    assert jnp.allclose(y, y_ref, atol=1.5e-1, rtol=5e-2), (
        f"mismatch vs reference, max abs err = {max_err}")

    print("KERNEL_OK")
</pallas_src>

<mosaic_0001>
module attributes {stable_mosaic.version = 11 : i64} {
  func.func @_bottleneck_kernel(%arg0: i32, %arg1: i32, %arg2: memref<1x8x16x128xbf16, #tpu.memory_space<vmem>>, %arg3: memref<1x2x16x128xbf16, #tpu.memory_space<vmem>>, %arg4: memref<128x32xbf16, #tpu.memory_space<vmem>>, %arg5: memref<1x32xf32, #tpu.memory_space<vmem>>, %arg6: memref<288x32xbf16, #tpu.memory_space<vmem>>, %arg7: memref<1x32xf32, #tpu.memory_space<vmem>>, %arg8: memref<32x128xbf16, #tpu.memory_space<vmem>>, %arg9: memref<1x128xf32, #tpu.memory_space<vmem>>, %arg10: memref<1x8x16x128xbf16, #tpu.memory_space<vmem>>, %arg11: memref<10x16x32xbf16, #tpu.memory_space<vmem>>) attributes {dimension_semantics = [#tpu.dimension_semantics<parallel>, #tpu.dimension_semantics<parallel>], iteration_bounds = array<i64: 2, 2>, scalar_prefetch = 0 : i64, scratch_operands = 1 : i64, tpu.core_type = #tpu.core_type<tc>, window_params = [{transform_indices = @transform_0, window_bounds = array<i64: 1, 8, 16, 128>}, {transform_indices = @transform_1, window_bounds = array<i64: 1, 2, 16, 128>}, {pipeline_mode = #tpu.pipeline_mode<synchronous>, transform_indices = @transform_2, window_bounds = array<i64: 128, 32>}, {pipeline_mode = #tpu.pipeline_mode<synchronous>, transform_indices = @transform_3, window_bounds = array<i64: 1, 32>}, {pipeline_mode = #tpu.pipeline_mode<synchronous>, transform_indices = @transform_4, window_bounds = array<i64: 288, 32>}, {pipeline_mode = #tpu.pipeline_mode<synchronous>, transform_indices = @transform_5, window_bounds = array<i64: 1, 32>}, {pipeline_mode = #tpu.pipeline_mode<synchronous>, transform_indices = @transform_6, window_bounds = array<i64: 32, 128>}, {pipeline_mode = #tpu.pipeline_mode<synchronous>, transform_indices = @transform_7, window_bounds = array<i64: 1, 128>}, {transform_indices = @transform_8, window_bounds = array<i64: 1, 8, 16, 128>}]} {
    %c0 = arith.constant 0 : index
    %c0_0 = arith.constant 0 : index
    %c0_1 = arith.constant 0 : index
    %c0_2 = arith.constant 0 : index
    %0 = vector.load %arg2[%c0, %c0_0, %c0_1, %c0_2] : memref<1x8x16x128xbf16, #tpu.memory_space<vmem>>, vector<1x8x16x128xbf16>
    %1 = vector.shape_cast %0 : vector<1x8x16x128xbf16> to vector<8x16x128xbf16>
    %2 = vector.shape_cast %1 : vector<8x16x128xbf16> to vector<128x128xbf16>
    %c0_3 = arith.constant 0 : index
    %c0_4 = arith.constant 0 : index
    %3 = vector.load %arg4[%c0_3, %c0_4] : memref<128x32xbf16, #tpu.memory_space<vmem>>, vector<128x32xbf16>
    %cst = arith.constant dense<0.000000e+00> : vector<128x32xf32>
    %4 = tpu.matmul %2, %3, %cst {dimension_numbers = #tpu.dot_dimension_numbers<[1], [0], [0], [1], [0, 0, 1, 1], [], []>} : vector<128x128xbf16>, vector<128x32xbf16>, vector<128x32xf32> -> vector<128x32xf32>
    %c0_5 = arith.constant 0 : index
    %c0_6 = arith.constant 0 : index
    %5 = vector.load %arg5[%c0_5, %c0_6] : memref<1x32xf32, #tpu.memory_space<vmem>>, vector<1x32xf32>
    %6 = vector.broadcast %5 : vector<1x32xf32> to vector<128x32xf32>
    %7 = arith.addf %4, %6 : vector<128x32xf32>
    %cst_7 = arith.constant 0.000000e+00 : f32
    %8 = vector.broadcast %cst_7 : f32 to vector<128x32xf32>
    %9 = arith.maximumf %7, %8 : vector<128x32xf32>
    %10 = vector.shape_cast %9 : vector<128x32xf32> to vector<8x16x32xf32>
    %11 = arith.truncf %10 : vector<8x16x32xf32> to vector<8x16x32xbf16>
    %c1 = arith.constant 1 : index
    %c0_8 = arith.constant 0 : index
    %c0_9 = arith.constant 0 : index
    %12 = vector.load %arg11[%c1, %c0_8, %c0_9] : memref<10x16x32xbf16, #tpu.memory_space<vmem>>, vector<8x16x32xbf16>
    tpu.vector_store %arg11[%c1, %c0_8, %c0_9], %11 {strides = array<i32>} : memref<10x16x32xbf16, #tpu.memory_space<vmem>>, vector<8x16x32xbf16>,
    %c0_10 = arith.constant 0 : index
    %c0_11 = arith.constant 0 : index
    %c0_12 = arith.constant 0 : index
    %c0_13 = arith.constant 0 : index
    %13 = vector.load %arg3[%c0_10, %c0_11, %c0_12, %c0_13] : memref<1x2x16x128xbf16, #tpu.memory_space<vmem>>, vector<1x2x16x128xbf16>
    %14 = vector.shape_cast %13 : vector<1x2x16x128xbf16> to vector<2x16x128xbf16>
    %15 = vector.shape_cast %14 : vector<2x16x128xbf16> to vector<32x128xbf16>
    %c0_14 = arith.constant 0 : index
    %c0_15 = arith.constant 0 : index
    %16 = vector.load %arg4[%c0_14, %c0_15] : memref<128x32xbf16, #tpu.memory_space<vmem>>, vector<128x32xbf16>
    %cst_16 = arith.constant dense<0.000000e+00> : vector<32x32xf32>
    %17 = tpu.matmul %15, %16, %cst_16 {dimension_numbers = #tpu.dot_dimension_numbers<[1], [0], [0], [1], [0, 0, 1, 1], [], []>} : vector<32x128xbf16>, vector<128x32xbf16>, vector<32x32xf32> -> vector<32x32xf32>
    %c0_17 = arith.constant 0 : index
    %c0_18 = arith.constant 0 : index
    %18 = vector.load %arg5[%c0_17, %c0_18] : memref<1x32xf32, #tpu.memory_space<vmem>>, vector<1x32xf32>
    %19 = vector.broadcast %18 : vector<1x32xf32> to vector<32x32xf32>
    %20 = arith.addf %17, %19 : vector<32x32xf32>
    %cst_19 = arith.constant 0.000000e+00 : f32
    %21 = vector.broadcast %cst_19 : f32 to vector<32x32xf32>
    %22 = arith.maximumf %20, %21 : vector<32x32xf32>
    %23 = vector.shape_cast %22 : vector<32x32xf32> to vector<2x16x32xf32>
    %c0_i32 = arith.constant 0 : i32
    %24 = arith.cmpi sgt, %arg1, %c0_i32 : i32
    %25 = arith.extui %24 : i1 to i32
    %26 = arith.sitofp %25 : i32 to f32
    %c1_i32 = arith.constant 1 : i32
    %27 = arith.cmpi slt, %arg1, %c1_i32 : i32
    %28 = arith.extui %27 : i1 to i32
    %29 = arith.sitofp %28 : i32 to f32
    %30 = vector.extract_strided_slice %23 {offsets = [0, 0, 0], sizes = [1, 16, 32], strides = [1, 1, 1]} : vector<2x16x32xf32> to vector<1x16x32xf32>
    %31 = vector.shape_cast %30 : vector<1x16x32xf32> to vector<16x32xf32>
    %32 = vector.broadcast %26 : f32 to vector<16x32xf32>
    %33 = arith.mulf %31, %32 : vector<16x32xf32>
    %34 = arith.truncf %33 : vector<16x32xf32> to vector<16x32xbf16>
    %c0_20 = arith.constant 0 : index
    %c0_21 = arith.constant 0 : index
    %c0_22 = arith.constant 0 : index
    %35 = vector.load %arg11[%c0_20, %c0_21, %c0_22] : memref<10x16x32xbf16, #tpu.memory_space<vmem>>, vector<1x16x32xbf16>
    %36 = vector.shape_cast %35 : vector<1x16x32xbf16> to vector<16x32xbf16>
    %37 = vector.shape_cast %34 : vector<16x32xbf16> to vector<1x16x32xbf16>
    tpu.vector_store %arg11[%c0_20, %c0_21, %c0_22], %37 {strides = array<i32>} : memref<10x16x32xbf16, #tpu.memory_space<vmem>>, vector<1x16x32xbf16>,
    %38 = vector.extract_strided_slice %23 {offsets = [1, 0, 0], sizes = [1, 16, 32], strides = [1, 1, 1]} : vector<2x16x32xf32> to vector<1x16x32xf32>
    %39 = vector.shape_cast %38 : vector<1x16x32xf32> to vector<16x32xf32>
    %40 = vector.broadcast %29 : f32 to vector<16x32xf32>
    %41 = arith.mulf %39, %40 : vector<16x32xf32>
    %42 = arith.truncf %41 : vector<16x32xf32> to vector<16x32xbf16>
    %c9 = arith.constant 9 : index
    %c0_23 = arith.constant 0 : index
    %c0_24 = arith.constant 0 : index
    %43 = vector.load %arg11[%c9, %c0_23, %c0_24] : memref<10x16x32xbf16, #tpu.memory_space<vmem>>, vector<1x16x32xbf16>
    %44 = vector.shape_cast %43 : vector<1x16x32xbf16> to vector<16x32xbf16>
    %45 = vector.shape_cast %42 : vector<16x32xbf16> to vector<1x16x32xbf16>
    tpu.vector_store %arg11[%c9, %c0_23, %c0_24], %45 {strides = array<i32>} : memref<10x16x32xbf16, #tpu.memory_space<vmem>>, vector<1x16x32xbf16>,
    %c0_25 = arith.constant 0 : index
    %c0_26 = arith.constant 0 : index
    %c0_27 = arith.constant 0 : index
    %46 = vector.load %arg11[%c0_25, %c0_26, %c0_27] : memref<10x16x32xbf16, #tpu.memory_space<vmem>>, vector<10x16x32xbf16>
    %cst_28 = arith.constant 0.000000e+00 : bf16
    %47 = vector.broadcast %cst_28 : bf16 to vector<10x1x32xbf16>
    %48 = vector.extract_strided_slice %46 {offsets = [0, 0, 0], sizes = [10, 15, 32], strides = [1, 1, 1]} : vector<10x16x32xbf16> to vector<10x15x32xbf16>
    %49 = tpu.concatenate %47, %48 in 1 : vector<10x1x32xbf16>, vector<10x15x32xbf16> -> vector<10x16x32xbf16>
    %50 = vector.extract_strided_slice %46 {offsets = [0, 1, 0], sizes = [10, 15, 32], strides = [1, 1, 1]} : vector<10x16x32xbf16> to vector<10x15x32xbf16>
    %51 = tpu.concatenate %50, %47 in 1 : vector<10x15x32xbf16>, vector<10x1x32xbf16> -> vector<10x16x32xbf16>
    %52 = tpu.concatenate %49, %46, %51 in 2 : vector<10x16x32xbf16>, vector<10x16x32xbf16>, vector<10x16x32xbf16> -> vector<10x16x96xbf16>
    %53 = vector.shape_cast %52 : vector<10x16x96xbf16> to vector<160x96xbf16>
    %54 = vector.extract_strided_slice %53 {offsets = [0, 0], sizes = [128, 96], strides = [1, 1]} : vector<160x96xbf16> to vector<128x96xbf16>
    %c0_29 = arith.constant 0 : index
    %c0_30 = arith.constant 0 : index
    %55 = vector.load %arg6[%c0_29, %c0_30] : memref<288x32xbf16, #tpu.memory_space<vmem>>, vector<96x32xbf16>
    %cst_31 = arith.constant dense<0.000000e+00> : vector<128x32xf32>
    %56 = tpu.matmul %54, %55, %cst_31 {dimension_numbers = #tpu.dot_dimension_numbers<[1], [0], [0], [1], [0, 0, 1, 1], [], []>} : vector<128x96xbf16>, vector<96x32xbf16>, vector<128x32xf32> -> vector<128x32xf32>
    %57 = vector.extract_strided_slice %53 {offsets = [16, 0], sizes = [128, 96], strides = [1, 1]} : vector<160x96xbf16> to vector<128x96xbf16>
    %c96 = arith.constant 96 : index
    %c0_32 = arith.constant 0 : index
    %58 = vector.load %arg6[%c96, %c0_32] : memref<288x32xbf16, #tpu.memory_space<vmem>>, vector<96x32xbf16>
    %cst_33 = arith.constant dense<0.000000e+00> : vector<128x32xf32>
    %59 = tpu.matmul %57, %58, %cst_33 {dimension_numbers = #tpu.dot_dimension_numbers<[1], [0], [0], [1], [0, 0, 1, 1], [], []>} : vector<128x96xbf16>, vector<96x32xbf16>, vector<128x32xf32> -> vector<128x32xf32>
    %60 = arith.addf %56, %59 : vector<128x32xf32>
    %61 = vector.extract_strided_slice %53 {offsets = [32, 0], sizes = [128, 96], strides = [1, 1]} : vector<160x96xbf16> to vector<128x96xbf16>
    %c192 = arith.constant 192 : index
    %c0_34 = arith.constant 0 : index
    %62 = vector.load %arg6[%c192, %c0_34] : memref<288x32xbf16, #tpu.memory_space<vmem>>, vector<96x32xbf16>
    %cst_35 = arith.constant dense<0.000000e+00> : vector<128x32xf32>
    %63 = tpu.matmul %61, %62, %cst_35 {dimension_numbers = #tpu.dot_dimension_numbers<[1], [0], [0], [1], [0, 0, 1, 1], [], []>} : vector<128x96xbf16>, vector<96x32xbf16>, vector<128x32xf32> -> vector<128x32xf32>
    %64 = arith.addf %60, %63 : vector<128x32xf32>
    %c0_36 = arith.constant 0 : index
    %c0_37 = arith.constant 0 : index
    %65 = vector.load %arg7[%c0_36, %c0_37] : memref<1x32xf32, #tpu.memory_space<vmem>>, vector<1x32xf32>
    %66 = vector.broadcast %65 : vector<1x32xf32> to vector<128x32xf32>
    %67 = arith.addf %64, %66 : vector<128x32xf32>
    %cst_38 = arith.constant 0.000000e+00 : f32
    %68 = vector.broadcast %cst_38 : f32 to vector<128x32xf32>
    %69 = arith.maximumf %67, %68 : vector<128x32xf32>
    %70 = arith.truncf %69 : vector<128x32xf32> to vector<128x32xbf16>
    %c0_39 = arith.constant 0 : index
    %c0_40 = arith.constant 0 : index
    %71 = vector.load %arg8[%c0_39, %c0_40] : memref<32x128xbf16, #tpu.memory_space<vmem>>, vector<32x128xbf16>
    %cst_41 = arith.constant dense<0.000000e+00> : vector<128x128xf32>
    %72 = tpu.matmul %70, %71, %cst_41 {dimension_numbers = #tpu.dot_dimension_numbers<[1], [0], [0], [1], [0, 0, 1, 1], [], []>} : vector<128x32xbf16>, vector<32x128xbf16>, vector<128x128xf32> -> vector<128x128xf32>
    %c0_42 = arith.constant 0 : index
    %c0_43 = arith.constant 0 : index
    %73 = vector.load %arg9[%c0_42, %c0_43] : memref<1x128xf32, #tpu.memory_space<vmem>>, vector<1x128xf32>
    %74 = vector.broadcast %73 : vector<1x128xf32> to vector<128x128xf32>
    %75 = arith.addf %72, %74 : vector<128x128xf32>
    %76 = arith.extf %2 : vector<128x128xbf16> to vector<128x128xf32>
    %77 = arith.addf %75, %76 : vector<128x128xf32>
    %cst_44 = arith.constant 0.000000e+00 : f32
    %78 = vector.broadcast %cst_44 : f32 to vector<128x128xf32>
    %79 = arith.maximumf %77, %78 : vector<128x128xf32>
    %80 = vector.shape_cast %79 : vector<128x128xf32> to vector<1x8x16x128xf32>
    %81 = arith.truncf %80 : vector<1x8x16x128xf32> to vector<1x8x16x128xbf16>
    %c0_45 = arith.constant 0 : index
    %c0_46 = arith.constant 0 : index
    %c0_47 = arith.constant 0 : index
    %c0_48 = arith.constant 0 : index
    %82 = vector.load %arg10[%c0_45, %c0_46, %c0_47, %c0_48] : memref<1x8x16x128xbf16, #tpu.memory_space<vmem>>, vector<1x8x16x128xbf16>
    tpu.vector_store %arg10[%c0_45, %c0_46, %c0_47, %c0_48], %81 {strides = array<i32>} : memref<1x8x16x128xbf16, #tpu.memory_space<vmem>>, vector<1x8x16x128xbf16>,
    return
  }
  func.func @transform_0(%arg0: i32, %arg1: i32) -> (i32, i32, i32, i32) {
    %c0_i32 = arith.constant 0 : i32
    %c0_i32_0 = arith.constant 0 : i32
    %c0_i32_1 = arith.constant 0 : i32
    return %arg0, %arg1, %c0_i32, %c0_i32_0 : i32, i32, i32, i32
  }
  func.func @transform_1(%arg0: i32, %arg1: i32) -> (i32, i32, i32, i32) {
    %c0_i32 = arith.constant 0 : i32
    %c0_i32_0 = arith.constant 0 : i32
    %c0_i32_1 = arith.constant 0 : i32
    return %arg0, %arg1, %c0_i32, %c0_i32_0 : i32, i32, i32, i32
  }
  func.func @transform_2(%arg0: i32, %arg1: i32) -> (i32, i32) {
    %c0_i32 = arith.constant 0 : i32
    %c0_i32_0 = arith.constant 0 : i32
    %c0_i32_1 = arith.constant 0 : i32
    return %c0_i32, %c0_i32_0 : i32, i32
  }
  func.func @transform_3(%arg0: i32, %arg1: i32) -> (i32, i32) {
    %c0_i32 = arith.constant 0 : i32
    %c0_i32_0 = arith.constant 0 : i32
    %c0_i32_1 = arith.constant 0 : i32
    return %c0_i32, %c0_i32_0 : i32, i32
  }
  func.func @transform_4(%arg0: i32, %arg1: i32) -> (i32, i32) {
    %c0_i32 = arith.constant 0 : i32
    %c0_i32_0 = arith.constant 0 : i32
    %c0_i32_1 = arith.constant 0 : i32
    return %c0_i32, %c0_i32_0 : i32, i32
  }
  func.func @transform_5(%arg0: i32, %arg1: i32) -> (i32, i32) {
    %c0_i32 = arith.constant 0 : i32
    %c0_i32_0 = arith.constant 0 : i32
    %c0_i32_1 = arith.constant 0 : i32
    return %c0_i32, %c0_i32_0 : i32, i32
  }
  func.func @transform_6(%arg0: i32, %arg1: i32) -> (i32, i32) {
    %c0_i32 = arith.constant 0 : i32
    %c0_i32_0 = arith.constant 0 : i32
    %c0_i32_1 = arith.constant 0 : i32
    return %c0_i32, %c0_i32_0 : i32, i32
  }
  func.func @transform_7(%arg0: i32, %arg1: i32) -> (i32, i32) {
    %c0_i32 = arith.constant 0 : i32
    %c0_i32_0 = arith.constant 0 : i32
    %c0_i32_1 = arith.constant 0 : i32
    return %c0_i32, %c0_i32_0 : i32, i32
  }
  func.func @transform_8(%arg0: i32, %arg1: i32) -> (i32, i32, i32, i32) {
    %c0_i32 = arith.constant 0 : i32
    %c0_i32_0 = arith.constant 0 : i32
    %c0_i32_1 = arith.constant 0 : i32
    return %arg0, %arg1, %c0_i32, %c0_i32_0 : i32, i32, i32, i32
  }
}

</mosaic_0001>

<bundles_post_ra>
// kernel: tpu_custom_call.1
= control target key start
LH: loop header
LB: loop body
LE: loop exit
PB: predicated region body
PF: predicated region fallthrough
CT: control target
= control target key end

     0   :  { %s3030_s0 = inlined_call_operand.hbm [shape: bf16[2,16,16,128], index: 0, kind: input, shape index: {}]   ;;  %s3031_s1 = inlined_call_operand.vmem [shape: bf16[2,4,16,128], index: 1, kind: input, shape index: {}]   ;;  %s3032_s2 = inlined_call_operand.vmem [shape: bf16[128,32], index: 2, kind: input, shape index: {}]   ;;  %s3033_s3 = inlined_call_operand.vmem [shape: f32[1,32], index: 3, kind: input, shape index: {}]   ;;  %s3034_s4 = inlined_call_operand.vmem [shape: bf16[288,32], index: 4, kind: input, shape index: {}]   ;;  %s3035_s5 = inlined_call_operand.vmem [shape: f32[1,32], index: 5, kind: input, shape index: {}]   ;;  %s3036_s6 = inlined_call_operand.vmem [shape: bf16[32,128], index: 6, kind: input, shape index: {}]   ;;  %s3037_s7 = inlined_call_operand.vmem [shape: f32[1,128], index: 7, kind: input, shape index: {}]   ;;  %s3038_s8 = inlined_call_operand.hbm [shape: bf16[2,16,16,128], index: 8, kind: output, shape index: {}]  }
   0x1   :  { %3047 = sst [smem:[#allocation16_spill]] %s3038_s8 }
   0x2   :  { %13 = vsyncpa [#allocation4], 0 }
   0x3   :  { %15 = vsyncpa [#allocation4 + $0x1], 0 }
   0x4   :  { %16 = vsyncpa [#allocation5], 0 }
   0x5   :  { %18 = vsyncpa [#allocation5 + $0x1], 0  ;;  %s2392_s27 = smov 0   ;;  %s2394_s28 = smov 0  }
   0x6   :  { %s2396_s29 = smov 0   ;;  %s2398_s30 = smov 0  }
   0x7   :  { %s2400_s9 = smov 0   ;;  %s2402_s10 = smov 0  }
   0x8   :  { %s2404_s11 = smov 0   ;;  %s2406_s12 = smov 0  }
   0x9 LB: > { %3048 = sst [smem:[#allocation9_spill]] %s2312_s27  ;;  %s1729_s13 = sadd.s32 4294967295, %s2340_s12   ;;  %s2340_s12 = sphi %s2406_s12, %s24_s12   ;;  %s2336_s11 = sphi %s2404_s11, %s3076_s11   ;;  %s2332_s10 = sphi %s2402_s10, %s3075_s10   ;;  %s2328_s9 = sphi %s2400_s9, %s3074_s9   ;;  %s2324_s30 = sphi %s2398_s30, %s3073_s30   ;;  %s2320_s29 = sphi %s2396_s29, %s3068_s29   ;;  %s2316_s28 = sphi %s2394_s28, %s3072_s28   ;;  %s2312_s27 = sphi %s2392_s27, %s3071_s27  }
   0xa   : > { %3049 = sst [smem:[#allocation10_spill]] %s2320_s29  ;;  %s1730_s14 = sadd.s32 4294967294, %s2340_s12  }
   0xb   : > { %s33_s15 = sadd.s32 1, %s2332_s10  ;;  %s36_s16 = sadd.s32 1, %s2336_s11 }
   0xc   : > { %p34_p0 = scmp.ge.s32.totalorder %s33_s15, 2  ;;  %s45_s17 = sadd.s32 1, %s2320_s29 }
   0xd   : > { %p52_p1 = scmp.ne.s32.totalorder %s2320_s29, %s2316_s28  ;;  %p53_p2 = scmp.eq.s32.totalorder %s2340_s12, 0 }
   0xe   : > { %s3078_s15 = smov (%p34_p0, %s33_s15), 0  ;;  %s3080_s16 = smov (!%p34_p0, %s36_s16), %s2336_s11 }
   0xf   : > { %3050 = sst [smem:[#allocation11_spill]] %s3078_s15  ;;  %s41_s18 = ssub.s32 %s2332_s10, %s3078_s15 }
  0x10   : > { %p2445_p3 = por %p53_p2, %p52_p1  ;;  %p38_p4 = scmp.ge.s32.totalorder %s3080_s16, 2 }
  0x11   : > { %p58_p5 = scmp.ne.s32.totalorder %s2316_s28, %s2312_s27  ;;  %p59_p6 = scmp.eq.s32.totalorder %s1729_s13, 0 }
  0x12   : > { %p238_p7 = scmp.eq.s32.totalorder %s1729_s13, 3  ;;  %s3082_s16 = smov (%p38_p4, %s3080_s16), 0 }
  0x13   : > { %3052 = sst [smem:[#allocation12_spill]] %s3082_s16  ;;  %p2453_p8 = por %p59_p6, %p58_p5 }
  0x14   : > { %p2457_p9 = por %p238_p7, %p52_p1  ;;  %s40_s22 = ssub.s32 %s2336_s11, %s3082_s16 }
  0x15   : > { %p244_p10 = scmp.eq.s32.totalorder %s1730_s14, 3  ;;  %s42_s23 = sor.u32 %s41_s18, %s40_s22 }
  0x16   : > { %s3054_s21 = scalar_select %p2457_p9, 1, 0 }
  0x17   : > { %p43_p11 = scmp.eq.s32.totalorder %s42_s23, 0  ;;  %p2463_p12 = por %p244_p10, %p58_p5 }
  0x18   : > { %3055 = sst [smem:[#allocation13_spill]] %s3054_s21  ;;  %p2137_p13 = scmp.lt.s32.totalorder %s2340_s12, 4 }
  0x19   : > { %s3056_s24 = scalar_select %p2463_p12, 1, 0 }
  0x1a   : > { %s282_s25 = sand.u32 1, %s2320_s29   ;;  %s2008_s15 = sshll.u32 %s2332_s10, 4 }
  0x1b   : > { %3057 = sst [smem:[#allocation14_spill]] %s3056_s24  ;;  %s1733_s13 = sshll.u32 %s282_s25, 6 }
  0x1c   : > { %s2470_s26 = scalar_select %p43_p11, %s2320_s29, %s45_s17  }
  0x1d   : > { %s1736_s27 = sshll.u32 %s2336_s11, 5  ;;  %s286_s8 = scalar_lea.vmem [#allocation3], %s1733_s13 }
  0x1e   : > { %3058 = sst [smem:[#allocation15_spill]] %s2470_s26  ;;  %s297_s21 = sshll.u32 %s286_s8, 4  ;;  %s298_s21 = int_to_ptr.vmem [resolvable:$true] %s297_s21 }
  0x1f   : > { %s292_s16 = sadd.s32 %s2008_s15, %s1736_s27  ;;  %p2130_p0 = pnand %p2137_p13, %p2445_p3 }
  0x20   : > { %s1737_s14 = sshll.u32 %s292_s16, 2  ;;  %s283_s17 = scalar_lea.sflag [#allocation4], %s282_s25 }
  0x21   : > { %s294_s23 = scalar_lea.hbm %s3030_s0, %s1737_s14  ;;  %s2342_s26 = smov 64  }
  0x22   : > { %s295_s24 = sshll.u32 %s294_s23, 4  ;;  %s2343_s29 = smov 4   ;;  %s296_s24 = int_to_ptr.hbm [resolvable:$true] %s295_s24 }
  0x23   : > { %2132 = dma.hbm_to_vmem [thread:$0]  (!%p2130_p0), %s296_s24, 1024, %s298_s21, %s283_s17, %s2342_s26, %s2342_s26, %s2343_s29  }
  0x24   : > { %p1738_p1 = scmp.ge.s32.totalorder %s2340_s12, 1  ;;  %p319_p2 = scmp.lt.s32.totalorder %s2340_s12, 5 }
  0x26   : > { %p320_p4 = pnand %p1738_p1, %p319_p2 }
  0x27   : > { %s2482_s8 = sand.u32 (!%p320_p4), 1, %s2316_s28  }
  0x28   : > { %323 = sbr.rel (%p320_p4) target bundleno = 892 (0x37c), region = 52  ;;  %s1739_s27 = sshll.u32 (!%p320_p4), %s2482_s8, 6 }
  0x29   : > { %s326_s15 = scalar_lea.sflag (!%p320_p4), [#allocation4], %s2482_s8  ;;  %s2488_s16 = scalar_lea.vmem (!%p320_p4), [#allocation3], %s1739_s27 }
  0x2d   : > { %2303 = dma.done.wait (%p2453_p8), %s326_s15, 1024  }
  0x2e   : > { %2305 = vsyncadd (%p2453_p8), %s326_s15, 4294966272  ;;  %v2024_v0 = vld [vmem:[%s3032_s2 + $0x38] sm:$0xff]  ;;  %v2023_v1 = vld [vmem:[%s3032_s2 + $0x30] sm:$0xff]  ;;  %s1741_s14 = sshll.u32 %s2324_s30, 1  ;;  %p375_p3 = scmp.lt.s32.totalorder %s2328_s9, 1  ;;  %vm601_vm0 = vcmask 257024  }
  0x2f   : > { %519 = vmatpush.bf16.msra.mxu0 %v2024_v0  ;;  %v2022_v2 = vld [vmem:[%s3032_s2 + $0x28] sm:$0xff]  ;;  %v2021_v3 = vld [vmem:[%s3032_s2 + $0x20] sm:$0xff]  ;;  %v2020_v4 = vld [vmem:[%s3032_s2 + $0x18] sm:$0xff]  ;;  %p377_p5 = scmp.lt.s32.totalorder %s1741_s14, 3  ;;  %p725_p6 = scmp.gt.s32.totalorder %s2324_s30, 0  ;;  %vm939_vm1 = vcmask 1047552  }
  0x30   : > { %v2019_v5 = vld [vmem:[%s3032_s2 + $0x10] sm:$0xff]  ;;  %v2018_v6 = vld [vmem:[%s3032_s2 + $0x8] sm:$0xff]  ;;  %v2017_v7 = vld [vmem:[%s3032_s2] sm:$0xff]  ;;  %s376_s23 = scalar_select %p375_p3, %s2328_s9, 1  ;;  %vm940_vm2 = vsmask.f32 7424 }
  0x31   : > { %v2009_v8 = vld [vmem:[%s2488_s16] sm:$0xff]  ;;  %v2010_v9 = vld [vmem:[%s2488_s16 + $0x8] sm:$0xff]  ;;  %v2011_v11 = vld [vmem:[%s2488_s16 + $0x10] sm:$0xff]  ;;  %s3084_s14 = smov (!%p377_p5, %s1741_s14), 3  ;;  %p728_p7 = scmp.lt.s32.totalorder %s2324_s30, 1  ;;  %vm896_vm4 = vcmask 1040384  }
  0x32   : > { %v2034_v10 = vld [vmem:[%s3032_s2 + $0x38] sm:$0xff]  ;;  %v2033_v12 = vld [vmem:[%s3032_s2 + $0x30] sm:$0xff]  ;;  %v2032_v13 = vld [vmem:[%s3032_s2 + $0x28] sm:$0xff]  ;;  %s1742_s29 = sshll.u32 %s3084_s14, 1  ;;  %s1743_s19 = sshll.u32 %s376_s23, 3  ;;  %vm1002_vm6 = vcmask 261120  }
  0x33   : > { %520 = vmatpush.bf16.msra.mxu0 %v2023_v1  ;;  %702 = vmatpush.bf16.msra.mxu1 %v2034_v10  ;;  %v2031_v14 = vld [vmem:[%s3032_s2 + $0x20] sm:$0xff]  ;;  %v2030_v15 = vld [vmem:[%s3032_s2 + $0x18] sm:$0xff]  ;;  %v2012_v16 = vld [vmem:[%s2488_s16 + $0x18] sm:$0xff]  ;;  %s381_s25 = sadd.s32 %s1743_s19, %s1742_s29  ;;  %s2345_s18 = smov 64   ;;  %vm897_vm5 = vsmask.f32 256 }
  0x34   : > { %v2029_v17 = vld [vmem:[%s3032_s2 + $0x10] sm:$0xff]  ;;  %v2028_v18 = vld [vmem:[%s3032_s2 + $0x8] sm:$0xff]  ;;  %s1744_s20 = sshll.u32 %s381_s25, 2  ;;  %v2027_v19 = vld [vmem:[%s3032_s2] sm:$0xff]  ;;  %vm1033_vm8 = vcmask 523264   ;;  %vm1114_vm9 = vcmask 785408  }
  0x35   : > { %s383_s17 = scalar_lea.vmem %s3031_s1, %s1744_s20  ;;  %v2013_v21 = vld [vmem:[%s2488_s16 + $0x20] sm:$0xff]  ;;  %v2014_v22 = vld [vmem:[%s2488_s16 + $0x28] sm:$0xff]  ;;  %v2015_v23 = vld [vmem:[%s2488_s16 + $0x30] sm:$0xff]  ;;  %s2344_s20 = smov 32  }
  0x36   : > { %v2025_v20 = vld [vmem:[%s383_s17] sm:$0xff]  ;;  %v2026_v24 = vld [vmem:[%s383_s17 + $0x8] sm:$0xff]  ;;  %s726_s19 = scalar_select %p725_p6, 1, 0  ;;  %vm2655_vm3 = vmand %vm939_vm1, %vm940_vm2 }
  0x37   : > { %521 = vmatpush.bf16.msra.mxu0 %v2022_v2  ;;  %703 = vmatpush.bf16.msra.mxu1 %v2033_v12  ;;  %v2016_v25 = vld [vmem:[%s2488_s16 + $0x38] sm:$0xff]  ;;  %v2559_v26 = vld [vmem:[%s3033_s3] ss:$0 sm:$0xff]  ;;  %s729_s26 = scalar_select %p728_p7, 1, 0  ;;  %vm2792_vm7 = vmand %vm896_vm4, %vm897_vm5 }
  0x38   : > { %s727_s21 = scvt.s32.f32 %s726_s19  ;;  %s2952_s29 = scalar_lea.vmem [#allocation6], %s1739_s27 }
  0x39   : > { %s730_s13 = scvt.s32.f32 %s729_s26  ;;  %s2065_s27 = sshll.u32 %s2324_s30, 4 }
  0x3a   : > { %s2004_s19 = sshll.u32 %s2328_s9, 5  ;;  %s1615_s9 = sshll.u32 %s2952_s29, 4  ;;  %s1616_s9 = int_to_ptr.vmem [resolvable:$true] %s1615_s9 }
  0x3b   : > { %522 = vmatpush.bf16.msra.mxu0 %v2021_v3  ;;  %704 = vmatpush.bf16.msra.mxu1 %v2032_v13  ;;  %s1600_s14 = scalar_lea.sflag [#allocation5], %s2482_s8 }
  0x3f   : > { %523 = vmatpush.bf16.msra.mxu0 %v2020_v4  ;;  %705 = vmatpush.bf16.msra.mxu1 %v2031_v14 }
  0x43   : > { %524 = vmatpush.bf16.msra.mxu0 %v2019_v5  ;;  %706 = vmatpush.bf16.msra.mxu1 %v2030_v15  ;;  %v731_v15 = vstv %s727_s21  ;;  %s1612_s21 = sadd.s32 %s2065_s27, %s2004_s19 }
  0x44   : > { %s2005_s24 = sshll.u32 %s1612_s21, 2 }
  0x47   : > { %525 = vmatpush.bf16.msra.mxu0 %v2018_v6  ;;  %707 = vmatpush.bf16.msra.mxu1 %v2029_v17 }
  0x4b   : > { %526 = vmatpush.bf16.msra.mxu0 %v2017_v7  ;;  %708 = vmatpush.bf16.msra.mxu1 %v2028_v18 }
  0x4e   : > { %527 = vmatmul.bf16.vlgmr.msra.gmra.mxu0 %v2009_v8 }
  0x4f   : > { %709 = vmatpush.bf16.msra.mxu1 %v2027_v19 }
  0x52   : > { %710 = vmatmul.bf16.vlgmr.msra.gmra.mxu1 %v2025_v20 }
  0x5e   : > { %532 = vmatmul.bf16.gmra.mxu0 %v2010_v9 }
  0x62   : > { %715 = vmatmul.bf16.gmra.mxu1 %v2026_v24 }
  0x6e   : > { %537 = vmatmul.bf16.gmra.mxu0 %v2011_v11  ;;  %v2611_v11 = vld [vmem:[%s3033_s3] ss:$0 sm:$0xff] }
  0x7e   : > { %542 = vmatmul.bf16.gmra.mxu0 %v2012_v16 }
  0x8e   : > { %547 = vmatmul.bf16.gmra.mxu0 %v2013_v21 }
  0x9e   : > { %552 = vmatmul.bf16.gmra.mxu0 %v2014_v22 }
  0xae   : > { %557 = vmatmul.bf16.gmra.mxu0 %v2015_v23 }
  0xbe   : > { %562 = vmatmul.bf16.gmra.mxu0 %v2016_v25 }
  0xcb   : > { %v528_v27 = vpop.f32.mrf.mxu0 }
  0xcc   : > { %v529_v28 = vadd.f32 %v2559_v26, %v528_v27 }
  0xce   : > { %v568_v29 = vmax.f32 %v529_v28, 0.0 }
  0xcf   : > { %v711_v10 = vpop.f32.mrf.mxu1 }
  0xd0   : > { %v584_v30 = vpack.c.bf16 %v568_v29, %v568_v29  ;;  %v712_v14 = vadd.f32 %v2611_v11, %v711_v10 }
  0xd2   : > { %602 = vst.msk [vmem:[#allocation2 + $0x8] sm:$0xf] %vm601_vm0, %v584_v30  ;;  %v721_v17 = vmax.f32 %v712_v14, 0.0 }
  0xd3   : > { %v530_v31 = vpop.f32.mrf.mxu0 }
  0xd4   : > { %v531_v32 = vadd.f32 %v2559_v26, %v530_v31  ;;  %v732_v19 = vmul.f32 %v731_v15, %v721_v17 }
  0xd6   : > { %v569_v33 = vmax.f32 %v531_v32, 0.0  ;;  %v734_v22 = vpack.c.bf16 %v732_v19, %v732_v19 }
  0xd7   : > { %v713_v20 = vpop.f32.mrf.mxu1 }
  0xd8   : > { %v585_v34 = vpack.c.bf16 %v569_v33, %v569_v33  ;;  %v714_v23 = vadd.f32 %v2611_v11, %v713_v20  ;;  %736 = vst.msk [vmem:[#allocation2] sm:$0xf] %vm601_vm0, %v734_v22 }
  0xda   : > { %603 = vst.msk [vmem:[#allocation2 + $0xc] sm:$0xf] %vm601_vm0, %v585_v34  ;;  %v722_v28 = vmax.f32 %v714_v23, 0.0 }
  0xdb   : > { %v533_v35 = vpop.f32.mrf.mxu0 }
  0xdc   : > { %v534_v36 = vadd.f32 %v2559_v26, %v533_v35  ;;  %v733_v32 = vmul.f32 %v731_v15, %v722_v28 }
  0xde   : > { %v570_v37 = vmax.f32 %v534_v36, 0.0  ;;  %v735_v35 = vpack.c.bf16 %v733_v32, %v733_v32 }
  0xe0   : > { %v586_v38 = vpack.c.bf16 %v570_v37, %v570_v37  ;;  %737 = vst.msk [vmem:[#allocation2 + $0x4] sm:$0xf] %vm601_vm0, %v735_v35 }
  0xe1   : > { %v2566_v39 = vld [vmem:[#allocation2 + $0x8] sm:$0xff] }
  0xe2   : > { %604 = vst.msk [vmem:[#allocation2 + $0x10] sm:$0xf] %vm601_vm0, %v586_v38  ;;  %v824_v41 = vshrl.u32 %v2566_v39, 16  ;;  %v827_v43 = vshll.u32 %v2566_v39, 16 }
  0xe3   : > { %v535_v40 = vpop.f32.mrf.mxu0 }
  0xe4   : > { %v536_v42 = vadd.f32 %v2559_v26, %v535_v40  ;;  %v826_v44 = vrot.slane %v824_v41, 7 }
  0xe6   : > { %v571_v45 = vmax.f32 %v536_v42, 0.0  ;;  %v2576_v46 = vor.u32 %v827_v43, %v826_v44 }
  0xe8   : > { %v587_v47 = vpack.c.bf16 %v571_v45, %v571_v45 }
  0xea   : > { %605 = vst.msk [vmem:[#allocation2 + $0x14] sm:$0xf] %vm601_vm0, %v587_v47 }
  0xeb   : > { %v538_v48 = vpop.f32.mrf.mxu0 }
  0xec   : > { %v539_v49 = vadd.f32 %v2559_v26, %v538_v48 }
  0xee   : > { %v572_v50 = vmax.f32 %v539_v49, 0.0 }
  0xf0   : > { %v588_v51 = vpack.c.bf16 %v572_v50, %v572_v50 }
  0xf1   : > { %v2580_v52 = vld [vmem:[#allocation2 + $0x10] sm:$0xff] }
  0xf2   : > { %606 = vst.msk [vmem:[#allocation2 + $0x18] sm:$0xf] %vm601_vm0, %v588_v51  ;;  %v831_v54 = vshrl.u32 %v2580_v52, 16  ;;  %v834_v57 = vshll.u32 %v2580_v52, 16 }
  0xf3   : > { %v540_v53 = vpop.f32.mrf.mxu0 }
  0xf4   : > { %v541_v55 = vadd.f32 %v2559_v26, %v540_v53  ;;  %v833_v56 = vrot.slane %v831_v54, 7 }
  0xf6   : > { %v573_v58 = vmax.f32 %v541_v55, 0.0  ;;  %v2590_v59 = vor.u32 %v834_v57, %v833_v56 }
  0xf8   : > { %v589_v60 = vpack.c.bf16 %v573_v58, %v573_v58  ;;  %v716_v58 = vpop.f32.mrf.mxu1 }
  0xfa   : > { %607 = vst.msk [vmem:[#allocation2 + $0x1c] sm:$0xf] %vm601_vm0, %v589_v60  ;;  %v717_v60 = vadd.f32 %v2611_v11, %v716_v58 }
  0xfb   : > { %v543_v61 = vpop.f32.mrf.mxu0 }
  0xfc   : > { %v544_v62 = vadd.f32 %v2559_v26, %v543_v61 }
  0xfe   : > { %v574_v63 = vmax.f32 %v544_v62, 0.0  ;;  %v738_v62 = vstv %s730_s13  ;;  %s3063_s13 = sld [smem:[#allocation16_spill]] }
 0x100   : > { %v590_v0 = vpack.c.bf16 %v574_v63, %v574_v63  ;;  %v723_v63 = vmax.f32 %v717_v60, 0.0 }
 0x101   : > { %v2595_v1 = vld [vmem:[#allocation2 + $0x18] sm:$0xff] }
 0x102   : > { %608 = vst.msk [vmem:[#allocation2 + $0x20] sm:$0xf] %vm601_vm0, %v590_v0  ;;  %v838_v3 = vshrl.u32 %v2595_v1, 16  ;;  %v841_v6 = vshll.u32 %v2595_v1, 16 }
 0x103   : > { %v545_v2 = vpop.f32.mrf.mxu0 }
 0x104   : > { %v546_v4 = vadd.f32 %v2559_v26, %v545_v2  ;;  %v840_v5 = vrot.slane %v838_v3, 7  ;;  %s1614_s30 = scalar_lea.hbm %s3063_s13, %s2005_s24  ;;  %s2262_s27 = scalar_lea.hbm %s3063_s13, 256 }
 0x106   : > { %v575_v7 = vmax.f32 %v546_v4, 0.0  ;;  %v2605_v8 = vor.u32 %v841_v6, %v840_v5  ;;  %v739_v4 = vmul.f32 %v738_v62, %v723_v63 }
 0x108   : > { %v591_v9 = vpack.c.bf16 %v575_v7, %v575_v7  ;;  %v741_v10 = vpack.c.bf16 %v739_v4, %v739_v4 }
 0x10a   : > { %609 = vst.msk [vmem:[#allocation2 + $0x24] sm:$0xf] %vm601_vm0, %v591_v9 }
 0x10b   : > { %v548_v12 = vpop.f32.mrf.mxu0  ;;  %744 = vst.msk [vmem:[#allocation2 + $0x48] sm:$0xf] %vm601_vm0, %v741_v10 }
 0x10c   : > { %v549_v13 = vadd.f32 %v2559_v26, %v548_v12 }
 0x10e   : > { %v576_v16 = vmax.f32 %v549_v13, 0.0  ;;  %v718_v13 = vpop.f32.mrf.mxu1 }
 0x110   : > { %v592_v18 = vpack.c.bf16 %v576_v16, %v576_v16  ;;  %v719_v16 = vadd.f32 %v2611_v11, %v718_v13 }
 0x111   : > { %v2615_v21 = vld [vmem:[#allocation2 + $0x20] sm:$0xff] }
 0x112   : > { %610 = vst.msk [vmem:[#allocation2 + $0x28] sm:$0xf] %vm601_vm0, %v592_v18  ;;  %v845_v25 = vshrl.u32 %v2615_v21, 16  ;;  %v848_v30 = vshll.u32 %v2615_v21, 16  ;;  %v2035_v18 = vld [vmem:[#allocation2] sm:$0xff]  ;;  %v724_v20 = vmax.f32 %v719_v16, 0.0 }
 0x113   : > { %v550_v24 = vpop.f32.mrf.mxu0  ;;  %v820_v35 = vshll.u32 %v2035_v18, 16 }
 0x114   : > { %v551_v27 = vadd.f32 %v2559_v26, %v550_v24  ;;  %v847_v29 = vrot.slane %v845_v25, 7  ;;  %v917_v10 = vrot.slane %v848_v30, 1  ;;  %v2061_v24 = vld [vmem:[%s3034_s4 + $0x80] sm:$0xff] }
 0x116   : > { %v577_v31 = vmax.f32 %v551_v27, 0.0  ;;  %v2627_v33 = vor.u32 %v848_v30, %v847_v29  ;;  %v817_v27 = vshrl.u32 %v2035_v18, 16  ;;  %v740_v29 = vmul.f32 %v738_v62, %v724_v20 }
 0x117   : > { %v918_v16 = vor.u32 %v917_v10, %v845_v25  ;;  %v2054_v25 = vld [vmem:[%s3034_s4 + $0x48] sm:$0xff] }
 0x118   : > { %v593_v34 = vpack.c.bf16 %v577_v31, %v577_v31  ;;  %v819_v31 = vrot.slane %v817_v27, 7  ;;  %v742_v32 = vpack.c.bf16 %v740_v29, %v740_v29 }
 0x11a   : > { %611 = vst.msk [vmem:[#allocation2 + $0x2c] sm:$0xf] %vm601_vm0, %v593_v34 }
 0x11b   : > { %v553_v36 = vpop.f32.mrf.mxu0  ;;  %745 = vst.msk [vmem:[#allocation2 + $0x4c] sm:$0xf] %vm601_vm0, %v742_v32 }
 0x11c   : > { %v554_v37 = vadd.f32 %v2559_v26, %v553_v36 }
 0x11e   : > { %v578_v38 = vmax.f32 %v554_v37, 0.0  ;;  %v2665_v37 = vor.u32 %v820_v35, %v819_v31 }
 0x120   : > { %v594_v40 = vpack.c.bf16 %v578_v38, %v578_v38 }
 0x121   : > { %v2632_v42 = vld [vmem:[#allocation2 + $0x28] sm:$0xff] }
 0x122   : > { %612 = vst.msk [vmem:[#allocation2 + $0x30] sm:$0xf] %vm601_vm0, %v594_v40  ;;  %v852_v45 = vshrl.u32 %v2632_v42, 16  ;;  %v855_v49 = vshll.u32 %v2632_v42, 16 }
 0x123   : > { %v555_v44 = vpop.f32.mrf.mxu0 }
 0x124   : > { %v556_v47 = vadd.f32 %v2559_v26, %v555_v44  ;;  %v854_v48 = vrot.slane %v852_v45, 7  ;;  %v911_v44 = vrot.slane %v827_v43, 1 }
 0x126   : > { %v579_v50 = vmax.f32 %v556_v47, 0.0  ;;  %v2643_v51 = vor.u32 %v855_v49, %v854_v48  ;;  %v912_v43 = vor.u32 %v911_v44, %v824_v41  ;;  %v2047_v44 = vld [vmem:[%s3034_s4 + $0x10] sm:$0xff] }
 0x128   : > { %v595_v53 = vpack.c.bf16 %v579_v50, %v579_v50 }
 0x12a   : > { %613 = vst.msk [vmem:[#allocation2 + $0x34] sm:$0xf] %vm601_vm0, %v595_v53  ;;  %v2056_v53 = vld [vmem:[%s3034_s4 + $0x58] sm:$0xff] }
 0x12b   : > { %v558_v55 = vpop.f32.mrf.mxu0  ;;  %1133 = vmatpush.bf16.msrb.mxu0 %v2056_v53  ;;  %2114 = vmatpush.bf16.msra.mxu3 %v2056_v53 }
 0x12c   : > { %v559_v56 = vadd.f32 %v2559_v26, %v558_v55  ;;  %2113 = vmatpush.bf16.msra.mxu2 %v2056_v53 }
 0x12e   : > { %v580_v61 = vmax.f32 %v559_v56, 0.0 }
 0x130   : > { %v596_v0 = vpack.c.bf16 %v580_v61, %v580_v61 }
 0x131   : > { %v2041_v2 = vld [vmem:[#allocation2 + $0x30] sm:$0xff] }
 0x132   : > { %614 = vst.msk [vmem:[#allocation2 + $0x38] sm:$0xf] %vm601_vm0, %v596_v0  ;;  %964 = vrot.lane.b32.xlu0 %v2041_v2, %s2344_s20  ;;  %v859_v7 = vshrl.u32 %v2041_v2, 16  ;;  %v862_v9 = vshll.u32 %v2041_v2, 16  ;;  %v909_v0 = vrot.slane %v820_v35, 1  ;;  %v2048_v35 = vld [vmem:[%s3034_s4 + $0x18] sm:$0xff] }
 0x133   : > { %v560_v5 = vpop.f32.mrf.mxu0 }
 0x134   : > { %v561_v12 = vadd.f32 %v2559_v26, %v560_v5  ;;  %v921_v14 = vrot.slane %v862_v9, 1  ;;  %v861_v15 = vrot.slane %v859_v7, 7  ;;  %v910_v4 = vor.u32 %v909_v0, %v817_v27  ;;  %v2045_v0 = vld [vmem:[%s3034_s4] sm:$0xff] }
 0x136   : > { %v581_v17 = vmax.f32 %v561_v12, 0.0  ;;  %v922_v19 = vor.u32 %v921_v14, %v859_v7  ;;  %v2653_v22 = vor.u32 %v862_v9, %v861_v15  ;;  %v942_v41 = vsel %vm2655_vm3, %v910_v4, 0  ;;  %v2055_v12 = vld [vmem:[%s3034_s4 + $0x50] sm:$0xff] }
 0x137   : > { %1134 = vmatpush.bf16.msrb.mxu0 %v2055_v12  ;;  %2116 = vmatpush.bf16.msra.mxu3 %v2055_v12 }
 0x138   : > { %v597_v23 = vpack.c.bf16 %v581_v17, %v581_v17  ;;  %v948_v28 = vsel %vm2655_vm3, %v922_v19, 0  ;;  %2115 = vmatpush.bf16.msra.mxu2 %v2055_v12  ;;  %v946_v19 = vsel %vm2655_vm3, %v918_v16, 0  ;;  %v905_v53 = vsel %vm2792_vm7, 0, %v2653_v22 }
 0x139   : > { %v901_v16 = vsel %vm2792_vm7, 0, %v2590_v59 }
 0x13a   : > { %615 = vst.msk [vmem:[#allocation2 + $0x3c] sm:$0xf] %vm601_vm0, %v597_v23  ;;  %994 = vrot.lane.b32.xlu0 %v948_v28, %s2345_s18  ;;  %v2720_v23 = vld [vmem:[#allocation2 + $0x48] sm:$0xff]  ;;  %v913_v28 = vrot.slane %v834_v57, 1 }
 0x13b   : > { %v563_v11 = vpop.f32.mrf.mxu0  ;;  %1135 = vmatpush.bf16.msrb.mxu0 %v2054_v25  ;;  %2118 = vmatpush.bf16.msra.mxu3 %v2054_v25  ;;  %v880_v29 = vshrl.u32 %v2720_v23, 16 }
 0x13c   : > { %v564_v34 = vadd.f32 %v2559_v26, %v563_v11  ;;  %2117 = vmatpush.bf16.msra.mxu2 %v2054_v25 }
 0x13e   : > { %v582_v36 = vmax.f32 %v564_v34, 0.0  ;;  %v2052_v34 = vld [vmem:[%s3034_s4 + $0x38] sm:$0xff] }
 0x140   : > { %v598_v38 = vpack.c.bf16 %v582_v36, %v582_v36  ;;  %v2060_v36 = vld [vmem:[%s3034_s4 + $0x78] sm:$0xff] }
 0x141   : > { %v2042_v40 = vld [vmem:[#allocation2 + $0x38] sm:$0xff] }
 0x142   : > { %616 = vst.msk [vmem:[#allocation2 + $0x40] sm:$0xf] %vm601_vm0, %v598_v38  ;;  %966 = vrot.lane.b32.xlu1 %v2042_v40, %s2344_s20  ;;  %952 = vrot.lane.b32.xlu0 %v2035_v18, %s2344_s20  ;;  %v866_v48 = vshrl.u32 %v2042_v40, 16  ;;  %v869_v50 = vshll.u32 %v2042_v40, 16  ;;  %v915_v18 = vrot.slane %v841_v6, 1  ;;  %v2053_v6 = vld [vmem:[%s3034_s4 + $0x40] sm:$0xff] }
 0x143   : > { %v565_v47 = vpop.f32.mrf.mxu0  ;;  %2120 = vmatpush.bf16.msra.mxu3 %v2053_v6  ;;  %1136 = vmatpush.bf16.msrb.mxu0 %v2053_v6  ;;  %v2059_v38 = vld [vmem:[%s3034_s4 + $0x70] sm:$0xff] }
 0x144   : > { %v566_v55 = vadd.f32 %v2559_v26, %v565_v47  ;;  %v923_v56 = vrot.slane %v869_v50, 1  ;;  %v868_v58 = vrot.slane %v866_v48, 7  ;;  %v943_v26 = vsel %vm2655_vm3, %v912_v43, 0  ;;  %2119 = vmatpush.bf16.msra.mxu2 %v2053_v6  ;;  %v2058_v47 = vld [vmem:[%s3034_s4 + $0x68] sm:$0xff] }
 0x145   : > { %v916_v20 = vor.u32 %v915_v18, %v838_v3  ;;  %v914_v3 = vor.u32 %v913_v28, %v831_v54  ;;  %v919_v54 = vrot.slane %v855_v49, 1  ;;  %v2051_v49 = vld [vmem:[%s3034_s4 + $0x30] sm:$0xff]  ;;  %v2046_v43 = vld [vmem:[%s3034_s4 + $0x8] sm:$0xff]  ;;  %v882_v28 = vrot.slane %v880_v29, 7 }
 0x146   : > { %v583_v60 = vmax.f32 %v566_v55, 0.0  ;;  %v924_v61 = vor.u32 %v923_v56, %v866_v48  ;;  %v2678_v62 = vor.u32 %v869_v50, %v868_v58  ;;  %v2057_v48 = vld [vmem:[%s3034_s4 + $0x60] sm:$0xff] }
 0x147   : > { %v945_v27 = vsel %vm2655_vm3, %v916_v20, 0  ;;  %v944_v57 = vsel %vm2655_vm3, %v914_v3, 0  ;;  %v920_v11 = vor.u32 %v919_v54, %v852_v45  ;;  %2122 = vmatpush.bf16.msra.mxu3 %v2052_v34  ;;  %1137 = vmatpush.bf16.msrb.mxu0 %v2052_v34  ;;  %v2062_v45 = vld [vmem:[%s3034_s4 + $0x88] sm:$0xff] }
 0x148   : > { %v599_v63 = vpack.c.bf16 %v583_v60, %v583_v60  ;;  %v949_v2 = vsel %vm2655_vm3, %v924_v61, 0  ;;  %2121 = vmatpush.bf16.msra.mxu2 %v2052_v34  ;;  %1319 = vmatpush.bf16.msrb.mxu1 %v2062_v45 }
 0x149   : > { %v947_v32 = vsel %vm2655_vm3, %v920_v11, 0 }
 0x14a   : > { %617 = vst.msk [vmem:[#allocation2 + $0x44] sm:$0xf] %vm601_vm0, %v599_v63  ;;  %996 = vrot.lane.b32.xlu1 %v949_v2, %s2345_s18  ;;  %984 = vrot.lane.b32.xlu0 %v943_v26, %s2345_s18  ;;  %v906_v2 = vsel %vm2792_vm7, 0, %v2678_v62 }
 0x14b   : > { %2124 = vmatpush.bf16.msra.mxu3 %v2051_v49  ;;  %1138 = vmatpush.bf16.msrb.mxu0 %v2051_v49 }
 0x14c   : > { %2123 = vmatpush.bf16.msra.mxu2 %v2051_v49  ;;  %1320 = vmatpush.bf16.msrb.mxu1 %v2061_v24 }
 0x150   : > { %1321 = vmatpush.bf16.msrb.mxu1 %v2060_v36 }
 0x151   : > { %v2043_v5 = vld [vmem:[#allocation2 + $0x40] sm:$0xff] }
 0x152   : > { %968 = vrot.lane.b32.xlu2 %v2043_v5, %s2344_s20  ;;  %982 = vrot.lane.b32.xlu1 %v942_v41, %s2345_s18  ;;  %v873_v7 = vshrl.u32 %v2043_v5, 16  ;;  %v876_v9 = vshll.u32 %v2043_v5, 16  ;;  %v900_v5 = vsel %vm2792_vm7, 0, %v2576_v46 }
 0x153   : > { %958 = vrot.lane.b32.xlu0 %v2595_v1, %s2344_s20  ;;  %v883_v1 = vshll.u32 %v2720_v23, 16 }
 0x154   : > { %v925_v13 = vrot.slane %v876_v9, 1  ;;  %v875_v14 = vrot.slane %v873_v7, 7  ;;  %1322 = vmatpush.bf16.msrb.mxu1 %v2059_v38 }
 0x155   : > { %v927_v31 = vrot.slane %v883_v1, 1  ;;  %v885_v11 = vor.u32 %v883_v1, %v882_v28 }
 0x156   : > { %v926_v15 = vor.u32 %v925_v13, %v873_v7  ;;  %v2700_v17 = vor.u32 %v876_v9, %v875_v14 }
 0x158   : > { %v950_v30 = vsel %vm2655_vm3, %v926_v15, 0  ;;  %1323 = vmatpush.bf16.msrb.mxu1 %v2058_v47  ;;  %v907_v14 = vsel %vm2792_vm7, 0, %v2700_v17  ;;  %v902_v17 = vsel %vm2792_vm7, 0, %v2605_v8  ;;  %v904_v8 = vsel %vm2792_vm7, 0, %v2643_v51 }
 0x159   : > { %v908_v51 = vsel %vm2792_vm7, 0, %v885_v11 }
 0x15a   : > { %998 = vrot.lane.b32.xlu2 %v950_v30, %s2345_s18  ;;  %956 = vrot.lane.b32.xlu1 %v2580_v52, %s2344_s20 }
 0x15b   : > { %990 = vrot.lane.b32.xlu0 %v946_v19, %s2345_s18 }
 0x15c   : > { %1324 = vmatpush.bf16.msrb.mxu1 %v2057_v48 }
 0x162   : > { %988 = vrot.lane.b32.xlu1 %v945_v27, %s2345_s18  ;;  %954 = vrot.lane.b32.xlu2 %v2566_v39, %s2344_s20  ;;  %v928_v39 = vor.u32 %v927_v31, %v880_v29  ;;  %v899_v31 = vsel %vm2792_vm7, 0, %v2665_v37  ;;  %v903_v37 = vsel %vm2792_vm7, 0, %v2627_v33  ;;  %v2064_v33 = vld [vmem:[%s3036_s6 + $0x8] sm:$0xff] }
 0x163   : > { %970 = vrot.lane.b32.xlu0 %v2720_v23, %s2344_s20  ;;  %1476 = vmatpush.bf16.msrb.mxu2 %v2064_v33 }
 0x164   : > { %v951_v52 = vsel %vm2655_vm3, %v928_v39, 0 }
 0x16a   : > { %962 = vrot.lane.b32.xlu1 %v2632_v42, %s2344_s20  ;;  %986 = vrot.lane.b32.xlu2 %v944_v57, %s2345_s18  ;;  %v2049_v42 = vld [vmem:[%s3034_s4 + $0x20] sm:$0xff] }
 0x172   : > { %1000 = vrot.lane.b32.xlu1 %v951_v52, %s2345_s18  ;;  %960 = vrot.lane.b32.xlu2 %v2615_v21, %s2344_s20  ;;  %v2050_v21 = vld [vmem:[%s3034_s4 + $0x28] sm:$0xff] }
 0x173   : > { %1220 = vmatpush.bf16.msrb.mxu3 %v2050_v21 }
 0x177   : > { %1221 = vmatpush.bf16.msrb.mxu3 %v2049_v42 }
 0x17a   : > { %992 = vrot.lane.b32.xlu2 %v947_v32, %s2345_s18 }
 0x17b   : > { %1222 = vmatpush.bf16.msrb.mxu3 %v2048_v35  ;;  %v2063_v35 = vld [vmem:[%s3036_s6] sm:$0xff] }
 0x17c   : > { %1477 = vmatpush.bf16.msrb.mxu2 %v2063_v35 }
 0x17f   : > { %1223 = vmatpush.bf16.msrb.mxu3 %v2047_v44 }
 0x183   : > { %1224 = vmatpush.bf16.msrb.mxu3 %v2046_v43 }
 0x187   : > { %1225 = vmatpush.bf16.msrb.mxu3 %v2045_v0 }
 0x1a4   : > { %v965_v40 = vpop.permute.xlu0 %964 }
 0x1a5   : > { %v1023_v55 = vsel %vm1002_vm6, %v905_v53, %v965_v40 }
 0x1ac   : > { %v969_v56 = vpop.permute.xlu2 %968  ;;  %v995_v58 = vpop.permute.xlu0 %994 }
 0x1ad   : > { %v2801_v60 = vsel %vm1033_vm8, %v1023_v55, %v995_v58  ;;  %v1029_v46 = vsel %vm1002_vm6, %v907_v14, %v969_v56 }
 0x1ae   : > { %1918 = vmatmul.msk.bf16.vlgmr.msra.gmra.mxu3 %vm1114_vm9, %v2801_v60 }
 0x1b4   : > { %v999_v61 = vpop.permute.xlu2 %998  ;;  %v967_v63 = vpop.permute.xlu1 %966 }
 0x1b5   : > { %v953_v22 = vpop.permute.xlu0 %952  ;;  %v1026_v26 = vsel %vm1002_vm6, %v906_v2, %v967_v63  ;;  %v1051_v18 = vsel %vm1033_vm8, %v1029_v46, %v999_v61  ;;  %v2910_v61 = vld [vmem:[%s3035_s5] ss:$0 sm:$0xff] }
 0x1b6   : > { %v1005_v57 = vsel %vm1002_vm6, %v899_v31, %v953_v22 }
 0x1bc   : > { %v997_v4 = vpop.permute.xlu1 %996  ;;  %v955_v41 = vpop.permute.xlu2 %954 }
 0x1bd   : > { %v1008_v7 = vsel %vm1002_vm6, %v900_v5, %v955_v41  ;;  %v985_v9 = vpop.permute.xlu0 %984  ;;  %v2820_v10 = vsel %vm1033_vm8, %v1026_v26, %v997_v4 }
 0x1be   : > { %v1037_v12 = vsel %vm1033_vm8, %v1008_v7, %v985_v9  ;;  %1919 = vmatmul.msk.bf16.gmra.mxu3 %vm1114_vm9, %v2820_v10 }
 0x1bf   : > { %1913 = vmatmul.msk.bf16.vlgmr.msrb.gmra.mxu0 %vm1114_vm9, %v1037_v12 }
 0x1c4   : > { %v983_v62 = vpop.permute.xlu1 %982  ;;  %v987_v13 = vpop.permute.xlu2 %986 }
 0x1c5   : > { %v959_v25 = vpop.permute.xlu0 %958  ;;  %v1035_v52 = vsel %vm1033_vm8, %v1005_v57, %v983_v62 }
 0x1c6   : > { %v1014_v59 = vsel %vm1002_vm6, %v902_v17, %v959_v25 }
 0x1cc   : > { %v957_v15 = vpop.permute.xlu1 %956  ;;  %v961_v6 = vpop.permute.xlu2 %960 }
 0x1cd   : > { %v1011_v30 = vsel %vm1002_vm6, %v901_v16, %v957_v15  ;;  %v991_v3 = vpop.permute.xlu0 %990  ;;  %v1017_v49 = vsel %vm1002_vm6, %v903_v37, %v961_v6 }
 0x1ce   : > { %1920 = vmatmul.msk.bf16.gmra.mxu3 %vm1114_vm9, %v1051_v18  ;;  %v1039_v19 = vsel %vm1033_vm8, %v1011_v30, %v987_v13  ;;  %v1043_v21 = vsel %vm1033_vm8, %v1017_v49, %v991_v3 }
 0x1cf   : > { %1914 = vmatmul.msk.bf16.gmra.mxu0 %vm1114_vm9, %v1039_v19  ;;  %1977 = vmatmul.msk.bf16.vlgmr.msrb.gmra.mxu1 %vm1114_vm9, %v1039_v19 }
 0x1d4   : > { %v989_v20 = vpop.permute.xlu1 %988  ;;  %v993_v54 = vpop.permute.xlu2 %992 }
 0x1d5   : > { %v1041_v27 = vsel %vm1033_vm8, %v1014_v59, %v989_v20  ;;  %v971_v34 = vpop.permute.xlu0 %970 }
 0x1d6   : > { %1915 = vmatmul.msk.bf16.vlgmr.msra.gmra.mxu2 %vm1114_vm9, %v1041_v27  ;;  %v1032_v23 = vsel %vm1002_vm6, %v908_v51, %v971_v34 }
 0x1dc   : > { %v963_v39 = vpop.permute.xlu1 %962 }
 0x1dd   : > { %v1020_v29 = vsel %vm1002_vm6, %v904_v8, %v963_v39 }
 0x1de   : > { %1945 = vmatmul.msk.bf16.vlgmr.msrb.gmra.mxu3 %vm1114_vm9, %v1035_v52  ;;  %v1045_v32 = vsel %vm1033_vm8, %v1020_v29, %v993_v54 }
 0x1df   : > { %1978 = vmatmul.msk.bf16.gmra.mxu1 %vm1114_vm9, %v1041_v27 }
 0x1e4   : > { %v1001_v1 = vpop.permute.xlu1 %1000 }
 0x1e5   : > { %v1053_v42 = vsel %vm1033_vm8, %v1032_v23, %v1001_v1 }
 0x1e6   : > { %1916 = vmatmul.msk.bf16.gmra.mxu2 %vm1114_vm9, %v1043_v21 }
 0x1ee   : > { %1946 = vmatmul.msk.bf16.gmra.mxu3 %vm1114_vm9, %v1037_v12 }
 0x1ef   : > { %1979 = vmatmul.msk.bf16.gmra.mxu1 %vm1114_vm9, %v1043_v21 }
 0x1f6   : > { %1917 = vmatmul.msk.bf16.gmra.mxu2 %vm1114_vm9, %v1045_v32 }
 0x1fe   : > { %1947 = vmatmul.msk.bf16.gmra.mxu3 %vm1114_vm9, %v1039_v19 }
 0x1ff   : > { %1980 = vmatmul.msk.bf16.gmra.mxu1 %vm1114_vm9, %v1045_v32 }
 0x20e   : > { %1948 = vmatmul.msk.bf16.gmra.mxu3 %vm1114_vm9, %v1041_v27 }
 0x20f   : > { %1981 = vmatmul.msk.bf16.gmra.mxu1 %vm1114_vm9, %v2801_v60 }
 0x21e   : > { %1949 = vmatmul.msk.bf16.gmra.mxu3 %vm1114_vm9, %v1043_v21 }
 0x21f   : > { %1982 = vmatmul.msk.bf16.gmra.mxu1 %vm1114_vm9, %v2820_v10 }
 0x22e   : > { %1950 = vmatmul.msk.bf16.gmra.mxu3 %vm1114_vm9, %v1045_v32 }
 0x22f   : > { %1983 = vmatmul.msk.bf16.gmra.mxu1 %vm1114_vm9, %v1051_v18 }
 0x231   : > { %v2887_v45 = vpop.f32.mrf.mxu3 }
 0x239   : > { %v2889_v24 = vpop.f32.mrf.mxu3 }
 0x23c   : > { %v1140_v50 = vpop.f32.mrf.mxu0 }
 0x23e   : > { %1951 = vmatmul.msk.bf16.gmra.mxu3 %vm1114_vm9, %v2801_v60 }
 0x23f   : > { %1984 = vmatmul.msk.bf16.gmra.mxu1 %vm1114_vm9, %v1053_v42 }
 0x241   : > { %v2897_v36 = vpop.f32.mrf.mxu3 }
 0x244   : > { %v1142_v60 = vpop.f32.mrf.mxu0 }
 0x249   : > { %v2899_v38 = vpop.f32.mrf.mxu3 }
 0x24c   : > { %v1326_v40 = vpop.f32.mrf.mxu1  ;;  %v1145_v41 = vpop.f32.mrf.mxu0 }
 0x24e   : > { %1952 = vmatmul.msk.bf16.gmra.mxu3 %vm1114_vm9, %v2820_v10 }
 0x251   : > { %v2903_v44 = vpop.f32.mrf.mxu3 }
 0x254   : > { %v1328_v47 = vpop.f32.mrf.mxu1  ;;  %v1147_v46 = vpop.f32.mrf.mxu0 }
 0x259   : > { %v2905_v48 = vpop.f32.mrf.mxu3  ;;  %v1150_v62 = vpop.f32.mrf.mxu2 }
 0x25c   : > { %v1331_v53 = vpop.f32.mrf.mxu1 }
 0x261   : > { %v1227_v55 = vpop.f32.mrf.mxu3  ;;  %v1152_v25 = vpop.f32.mrf.mxu2 }
 0x262   : > { %v1228_v56 = vadd.f32 %v1227_v55, %v1140_v50 }
 0x264   : > { %v1333_v58 = vpop.f32.mrf.mxu1  ;;  %v1366_v43 = vadd.f32 %v1326_v40, %v1228_v56 }
 0x266   : > { %v1386_v0 = vadd.f32 %v2910_v61, %v1366_v43 }
 0x268   : > { %v1402_v5 = vmax.f32 %v1386_v0, 0.0 }
 0x269   : > { %v1229_v63 = vpop.f32.mrf.mxu3  ;;  %v1155_v57 = vpop.f32.mrf.mxu2 }
 0x26a   : > { %v1230_v22 = vadd.f32 %v1229_v63, %v1142_v60 }
 0x26c   : > { %v1367_v2 = vadd.f32 %v1328_v47, %v1230_v22  ;;  %v1336_v26 = vpop.f32.mrf.mxu1 }
 0x26e   : > { %v1387_v4 = vadd.f32 %v2910_v61, %v1367_v2 }
 0x270   : > { %v1403_v7 = vmax.f32 %v1387_v4, 0.0 }
 0x271   : > { %v1232_v9 = vpop.f32.mrf.mxu3  ;;  %v1157_v34 = vpop.f32.mrf.mxu2 }
 0x272   : > { %v1418_v10 = vpack.c.bf16 %v1403_v7, %v1402_v5  ;;  %v1233_v12 = vadd.f32 %v1232_v9, %v1145_v41 }
 0x274   : > { %1993 = vmatmul.msk.bf16.vlgmr.msrb.gmra.mxu2 %vm1002_vm6, %v1418_v10  ;;  %v1338_v13 = vpop.f32.mrf.mxu1  ;;  %v1368_v14 = vadd.f32 %v1331_v53, %v1233_v12 }
 0x276   : > { %v1388_v30 = vadd.f32 %v2910_v61, %v1368_v14 }
 0x278   : > { %v1404_v17 = vmax.f32 %v1388_v30, 0.0 }
 0x279   : > { %v1234_v15 = vpop.f32.mrf.mxu3  ;;  %v1160_v40 = vpop.f32.mrf.mxu2 }
 0x27a   : > { %v1235_v16 = vadd.f32 %v1234_v15, %v1147_v46 }
 0x27c   : > { %v1369_v18 = vadd.f32 %v1333_v58, %v1235_v16  ;;  %v1341_v59 = vpop.f32.mrf.mxu1 }
 0x27e   : > { %v1389_v19 = vadd.f32 %v2910_v61, %v1369_v18 }
 0x280   : > { %v1405_v6 = vmax.f32 %v1389_v19, 0.0 }
 0x281   : > { %v1237_v20 = vpop.f32.mrf.mxu3  ;;  %v1162_v43 = vpop.f32.mrf.mxu2 }
 0x282   : > { %v1419_v27 = vpack.c.bf16 %v1405_v6, %v1404_v17  ;;  %v1238_v28 = vadd.f32 %v1237_v20, %v1150_v62 }
 0x284   : > { %1994 = vmatmul.msk.bf16.gmra.mxu2 %vm1002_vm6, %v1419_v27  ;;  %v1370_v3 = vadd.f32 %v1336_v26, %v1238_v28  ;;  %v1343_v39 = vpop.f32.mrf.mxu1 }
 0x286   : > { %v1390_v52 = vadd.f32 %v2910_v61, %v1370_v3 }
 0x288   : > { %v1406_v29 = vmax.f32 %v1390_v52, 0.0 }
 0x289   : > { %v1239_v31 = vpop.f32.mrf.mxu3 }
 0x28a   : > { %v1240_v8 = vadd.f32 %v1239_v31, %v1152_v25 }
 0x28c   : > { %v1371_v54 = vadd.f32 %v1338_v13, %v1240_v8  ;;  %v1346_v23 = vpop.f32.mrf.mxu1 }
 0x28e   : > { %v1391_v11 = vadd.f32 %v2910_v61, %v1371_v54 }
 0x290   : > { %v1407_v32 = vmax.f32 %v1391_v11, 0.0 }
 0x291   : > { %v1242_v37 = vpop.f32.mrf.mxu3 }
 0x292   : > { %v1420_v51 = vpack.c.bf16 %v1407_v32, %v1406_v29  ;;  %v1243_v49 = vadd.f32 %v1242_v37, %v1155_v57 }
 0x294   : > { %1995 = vmatmul.msk.bf16.gmra.mxu2 %vm1002_vm6, %v1420_v51  ;;  %v1372_v1 = vadd.f32 %v1341_v59, %v1243_v49  ;;  %v1348_v50 = vpop.f32.mrf.mxu1 }
 0x296   : > { %v1392_v33 = vadd.f32 %v2910_v61, %v1372_v1 }
 0x298   : > { %v1408_v53 = vmax.f32 %v1392_v33, 0.0 }
 0x299   : > { %v1244_v21 = vpop.f32.mrf.mxu3 }
 0x29a   : > { %v1245_v42 = vadd.f32 %v1244_v21, %v1157_v34 }
 0x29c   : > { %v1373_v35 = vadd.f32 %v1343_v39, %v1245_v42  ;;  %v1351_v22 = vpop.f32.mrf.mxu1 }
 0x29e   : > { %v1393_v47 = vadd.f32 %v2910_v61, %v1373_v35 }
 0x2a0   : > { %v1409_v55 = vmax.f32 %v1393_v47, 0.0 }
 0x2a1   : > { %v1247_v56 = vpop.f32.mrf.mxu3 }
 0x2a2   : > { %v1421_v58 = vpack.c.bf16 %v1409_v55, %v1408_v53  ;;  %v1248_v60 = vadd.f32 %v1247_v56, %v1160_v40 }
 0x2a4   : > { %1996 = vmatmul.msk.bf16.gmra.mxu2 %vm1002_vm6, %v1421_v58  ;;  %v1374_v63 = vadd.f32 %v1346_v23, %v1248_v60  ;;  %v1353_v12 = vpop.f32.mrf.mxu1  ;;  %v389_v60 = vld [vmem:[%s2488_s16 + $0x8] sm:$0xff]  }
 0x2a6   : > { %v1394_v26 = vadd.f32 %v2910_v61, %v1374_v63  ;;  %v1521_v63 = vunpack.c.l.bf16 %v389_v60 }
 0x2a8   : > { %v1410_v5 = vmax.f32 %v1394_v26, 0.0 }
 0x2a9   : > { %v1249_v0 = vpop.f32.mrf.mxu3 }
 0x2aa   : > { %v1250_v2 = vadd.f32 %v1249_v0, %v1162_v43 }
 0x2ac   : > { %v1375_v4 = vadd.f32 %v1348_v50, %v1250_v2  ;;  %v1356_v30 = vpop.f32.mrf.mxu1 }
 0x2ae   : > { %v1395_v41 = vadd.f32 %v2910_v61, %v1375_v4 }
 0x2b0   : > { %v1411_v7 = vmax.f32 %v1395_v41, 0.0 }
 0x2b1   : > { %v1252_v9 = vpop.f32.mrf.mxu3 }
 0x2b2   : > { %v1422_v10 = vpack.c.bf16 %v1411_v7, %v1410_v5  ;;  %v1253_v62 = vadd.f32 %v1252_v9, %v2887_v45 }
 0x2b4   : > { %1997 = vmatmul.msk.bf16.gmra.mxu2 %vm1002_vm6, %v1422_v10  ;;  %v1376_v13 = vadd.f32 %v1351_v22, %v1253_v62  ;;  %v1358_v45 = vpop.f32.mrf.mxu1  ;;  %v1522_v22 = vunpack.c.h.bf16 %v389_v60  ;;  %v391_v10 = vld [vmem:[%s2488_s16 + $0x10] sm:$0xff]  }
 0x2b5   : > { %v1523_v62 = vunpack.c.l.bf16 %v391_v10 }
 0x2b6   : > { %v1396_v15 = vadd.f32 %v2910_v61, %v1376_v13  ;;  %v1524_v13 = vunpack.c.h.bf16 %v391_v10 }
 0x2b8   : > { %v1412_v19 = vmax.f32 %v1396_v15, 0.0 }
 0x2b9   : > { %v1254_v14 = vpop.f32.mrf.mxu3 }
 0x2ba   : > { %v1255_v46 = vadd.f32 %v1254_v14, %v2889_v24 }
 0x2bc   : > { %v1377_v16 = vadd.f32 %v1353_v12, %v1255_v46  ;;  %v1361_v39 = vpop.f32.mrf.mxu1 }
 0x2be   : > { %v1397_v18 = vadd.f32 %v2910_v61, %v1377_v16 }
 0x2c0   : > { %v1413_v25 = vmax.f32 %v1397_v18, 0.0 }
 0x2c1   : > { %v1257_v17 = vpop.f32.mrf.mxu3 }
 0x2c2   : > { %v1423_v6 = vpack.c.bf16 %v1413_v25, %v1412_v19  ;;  %v1258_v59 = vadd.f32 %v1257_v17, %v2897_v36  ;;  %v393_v17 = vld [vmem:[%s2488_s16 + $0x18] sm:$0xff]  }
 0x2c4   : > { %1998 = vmatmul.msk.bf16.gmra.mxu2 %vm1002_vm6, %v1423_v6  ;;  %v1378_v20 = vadd.f32 %v1356_v30, %v1258_v59  ;;  %v1525_v59 = vunpack.c.l.bf16 %v393_v17 }
 0x2c6   : > { %v1398_v24 = vadd.f32 %v2910_v61, %v1378_v20 }
 0x2c8   : > { %v1414_v57 = vmax.f32 %v1398_v24, 0.0 }
 0x2c9   : > { %v1259_v27 = vpop.f32.mrf.mxu3 }
 0x2ca   : > { %v1260_v28 = vadd.f32 %v1259_v27, %v2899_v38  ;;  %v1363_v38 = vpop.f32.mrf.mxu1 }
 0x2cc   : > { %v1379_v3 = vadd.f32 %v1358_v45, %v1260_v28  ;;  %v1526_v45 = vunpack.c.h.bf16 %v393_v17 }
 0x2ce   : > { %v1399_v31 = vadd.f32 %v2910_v61, %v1379_v3 }
 0x2d0   : > { %v1415_v8 = vmax.f32 %v1399_v31, 0.0 }
 0x2d1   : > { %v1262_v52 = vpop.f32.mrf.mxu3 }
 0x2d2   : > { %v1424_v54 = vpack.c.bf16 %v1415_v8, %v1414_v57  ;;  %v1263_v36 = vadd.f32 %v1262_v52, %v2903_v44  ;;  %v2945_v44 = vld [vmem:[%s3037_s7] ss:$0 sm:$0xff] }
 0x2d4   : > { %1999 = vmatmul.msk.bf16.gmra.mxu2 %vm1002_vm6, %v1424_v54  ;;  %v1380_v11 = vadd.f32 %v1361_v39, %v1263_v36  ;;  %v395_v39 = vld [vmem:[%s2488_s16 + $0x20] sm:$0xff]  }
 0x2d5   : > { %v1527_v54 = vunpack.c.l.bf16 %v395_v39  ;;  %v1528_v36 = vunpack.c.h.bf16 %v395_v39 }
 0x2d6   : > { %v1400_v37 = vadd.f32 %v2910_v61, %v1380_v11 }
 0x2d8   : > { %v1416_v49 = vmax.f32 %v1400_v37, 0.0 }
 0x2d9   : > { %v1264_v29 = vpop.f32.mrf.mxu3 }
 0x2da   : > { %v1265_v32 = vadd.f32 %v1264_v29, %v2905_v48  ;;  %v387_v48 = vld [vmem:[%s2488_s16] sm:$0xff]  }
 0x2db   : > { %v1519_v33 = vunpack.c.l.bf16 %v387_v48  ;;  %v1520_v35 = vunpack.c.h.bf16 %v387_v48 }
 0x2dc   : > { %v1381_v51 = vadd.f32 %v1363_v38, %v1265_v32 }
 0x2de   : > { %v1401_v34 = vadd.f32 %v2910_v61, %v1381_v51 }
 0x2e0   : > { %v1417_v23 = vmax.f32 %v1401_v34, 0.0 }
 0x2e2   : > { %v1425_v1 = vpack.c.bf16 %v1417_v23, %v1416_v49  ;;  %v397_v23 = vld [vmem:[%s2488_s16 + $0x28] sm:$0xff]  }
 0x2e3   : > { %v1530_v48 = vunpack.c.h.bf16 %v397_v23 }
 0x2e4   : > { %2000 = vmatmul.msk.bf16.gmra.mxu2 %vm1002_vm6, %v1425_v1 }
 0x2f7   : > { %v1479_v21 = vpop.f32.mrf.mxu2 }
 0x2f8   : > { %v1480_v42 = vadd.f32 %v2945_v44, %v1479_v21  ;;  %v1529_v21 = vunpack.c.l.bf16 %v397_v23 }
 0x2fa   : > { %v1535_v61 = vadd.f32 %v1519_v33, %v1480_v42 }
 0x2fc   : > { %v1551_v53 = vmax.f32 %v1535_v61, 0.0 }
 0x2ff   : > { %v1481_v40 = vpop.f32.mrf.mxu2 }
 0x300   : > { %v1482_v47 = vadd.f32 %v2945_v44, %v1481_v40 }
 0x302   : > { %v1536_v50 = vadd.f32 %v1520_v35, %v1482_v47 }
 0x304   : > { %v1552_v55 = vmax.f32 %v1536_v50, 0.0 }
 0x306   : > { %v2069_v56 = vpack.c.bf16 %v1552_v55, %v1551_v53  ;;  %v399_v55 = vld [vmem:[%s2488_s16 + $0x30] sm:$0xff]  }
 0x307   : > { %v1484_v58 = vpop.f32.mrf.mxu2  ;;  %v1532_v60 = vunpack.c.h.bf16 %v399_v55 }
 0x308   : > { %2070 = vst [vmem:[%s2952_s29] sm:$0xff] %v2069_v56   ;;  %v1485_v43 = vadd.f32 %v2945_v44, %v1484_v58  ;;  %v1531_v58 = vunpack.c.l.bf16 %v399_v55 }
 0x30a   : > { %v1537_v2 = vadd.f32 %v1521_v63, %v1485_v43 }
 0x30c   : > { %v1553_v41 = vmax.f32 %v1537_v2, 0.0 }
 0x30f   : > { %v1486_v0 = vpop.f32.mrf.mxu2 }
 0x310   : > { %v1487_v26 = vadd.f32 %v2945_v44, %v1486_v0 }
 0x312   : > { %v1538_v4 = vadd.f32 %v1522_v22, %v1487_v26 }
 0x314   : > { %v1554_v5 = vmax.f32 %v1538_v4, 0.0 }
 0x316   : > { %v2074_v7 = vpack.c.bf16 %v1554_v5, %v1553_v41  ;;  %v401_v5 = vld [vmem:[%s2488_s16 + $0x38] sm:$0xff]   ;;  %s1617_s16 = sshll.u32 %s1614_s30, 4  ;;  %s1618_s16 = int_to_ptr.hbm [resolvable:$true] %s1617_s16 }
 0x317   : > { %v1489_v9 = vpop.f32.mrf.mxu2  ;;  %v1534_v10 = vunpack.c.h.bf16 %v401_v5  ;;  %s2256_s22 = sshra.s32 %s1618_s16, 4  ;;  %s2257_s22 = int_to_ptr.hbm [resolvable:$true] %s2256_s22 }
 0x318   : > { %2106 = vst [vmem:[%s2952_s29 + $0x8] sm:$0xff] %v2074_v7   ;;  %v1490_v12 = vadd.f32 %v2945_v44, %v1489_v9  ;;  %v1533_v9 = vunpack.c.l.bf16 %v401_v5  ;;  %s2258_s23 = scalar_lea.hbm %s2257_s22, 64  ;;  %p2263_p13 = scmp.lt.s32.totalorder %s2257_s22, %s3063_s13 }
 0x319   : > { %p2259_p8 = scmp.ne.s32.totalorder %s2257_s22, %s2258_s23  ;;  %p2264_p0 = scmp.lt.s32.totalorder %s2262_s27, %s2258_s23 }
 0x31a   : > { %v1539_v46 = vadd.f32 %v1523_v62, %v1490_v12 }
 0x31b   : > { %p2260_p10 = pnand %p2259_p8, %p2457_p9  ;;  %p2265_p1 = por %p2264_p0, %p2263_p13 }
 0x31c   : > { %v1555_v30 = vmax.f32 %v1539_v46, 0.0 }
 0x31d   : > { %p2261_p11 = pneg %p2260_p10 }
 0x31f   : > { %v1491_v14 = vpop.f32.mrf.mxu2  ;;  %p2266_p2 = pnand %p2265_p1, %p2261_p11 }
 0x320   : > { %v1492_v15 = vadd.f32 %v2945_v44, %v1491_v14 }
 0x322   : > { %v1540_v16 = vadd.f32 %v1524_v13, %v1492_v15 }
 0x324   : > { %v1556_v18 = vmax.f32 %v1540_v16, 0.0 }
 0x326   : > { %v2079_v19 = vpack.c.bf16 %v1556_v18, %v1555_v30 }
 0x327   : > { %v1494_v25 = vpop.f32.mrf.mxu2 }
 0x328   : > { %2107 = vst [vmem:[%s2952_s29 + $0x10] sm:$0xff] %v2079_v19   ;;  %v1495_v6 = vadd.f32 %v2945_v44, %v1494_v25 }
 0x32a   : > { %v1541_v27 = vadd.f32 %v1525_v59, %v1495_v6 }
 0x32c   : > { %v1557_v3 = vmax.f32 %v1541_v27, 0.0 }
 0x32f   : > { %v1496_v20 = vpop.f32.mrf.mxu2 }
 0x330   : > { %v1497_v28 = vadd.f32 %v2945_v44, %v1496_v20 }
 0x332   : > { %v1542_v24 = vadd.f32 %v1526_v45, %v1497_v28 }
 0x334   : > { %v1558_v31 = vmax.f32 %v1542_v24, 0.0 }
 0x336   : > { %v2084_v57 = vpack.c.bf16 %v1558_v31, %v1557_v3 }
 0x337   : > { %v1499_v8 = vpop.f32.mrf.mxu2 }
 0x338   : > { %2108 = vst [vmem:[%s2952_s29 + $0x18] sm:$0xff] %v2084_v57   ;;  %v1500_v52 = vadd.f32 %v2945_v44, %v1499_v8 }
 0x33a   : > { %v1543_v29 = vadd.f32 %v1527_v54, %v1500_v52 }
 0x33c   : > { %v1559_v37 = vmax.f32 %v1543_v29, 0.0 }
 0x33f   : > { %v1501_v11 = vpop.f32.mrf.mxu2 }
 0x340   : > { %v1502_v32 = vadd.f32 %v2945_v44, %v1501_v11 }
 0x342   : > { %v1544_v38 = vadd.f32 %v1528_v36, %v1502_v32 }
 0x344   : > { %v1560_v51 = vmax.f32 %v1544_v38, 0.0 }
 0x346   : > { %v2089_v34 = vpack.c.bf16 %v1560_v51, %v1559_v37 }
 0x347   : > { %v1504_v49 = vpop.f32.mrf.mxu2 }
 0x348   : > { %2109 = vst [vmem:[%s2952_s29 + $0x20] sm:$0xff] %v2089_v34   ;;  %v1505_v1 = vadd.f32 %v2945_v44, %v1504_v49 }
 0x34a   : > { %v1545_v33 = vadd.f32 %v1529_v21, %v1505_v1 }
 0x34c   : > { %v1561_v61 = vmax.f32 %v1545_v33, 0.0 }
 0x34f   : > { %v1506_v42 = vpop.f32.mrf.mxu2 }
 0x350   : > { %v1507_v35 = vadd.f32 %v2945_v44, %v1506_v42 }
 0x352   : > { %v1546_v40 = vadd.f32 %v1530_v48, %v1507_v35 }
 0x354   : > { %v1562_v47 = vmax.f32 %v1546_v40, 0.0 }
 0x356   : > { %v2094_v50 = vpack.c.bf16 %v1562_v47, %v1561_v61 }
 0x357   : > { %v1509_v53 = vpop.f32.mrf.mxu2 }
 0x358   : > { %2110 = vst [vmem:[%s2952_s29 + $0x28] sm:$0xff] %v2094_v50   ;;  %v1510_v56 = vadd.f32 %v2945_v44, %v1509_v53 }
 0x35a   : > { %v1547_v63 = vadd.f32 %v1531_v58, %v1510_v56 }
 0x35c   : > { %v1563_v2 = vmax.f32 %v1547_v63, 0.0 }
 0x35f   : > { %v1511_v43 = vpop.f32.mrf.mxu2 }
 0x360   : > { %v1512_v22 = vadd.f32 %v2945_v44, %v1511_v43 }
 0x362   : > { %v1548_v0 = vadd.f32 %v1532_v60, %v1512_v22 }
 0x364   : > { %v1564_v26 = vmax.f32 %v1548_v0, 0.0 }
 0x366   : > { %v2099_v4 = vpack.c.bf16 %v1564_v26, %v1563_v2 }
 0x367   : > { %v1514_v41 = vpop.f32.mrf.mxu2 }
 0x368   : > { %2111 = vst [vmem:[%s2952_s29 + $0x30] sm:$0xff] %v2099_v4   ;;  %v1515_v7 = vadd.f32 %v2945_v44, %v1514_v41 }
 0x36a   : > { %v1549_v62 = vadd.f32 %v1533_v9, %v1515_v7 }
 0x36c   : > { %v1565_v46 = vmax.f32 %v1549_v62, 0.0 }
 0x36f   : > { %v1516_v12 = vpop.f32.mrf.mxu2 }
 0x370   : > { %v1517_v13 = vadd.f32 %v2945_v44, %v1516_v12 }
 0x372   : > { %v1550_v14 = vadd.f32 %v1534_v10, %v1517_v13 }
 0x374   : > { %v1566_v15 = vmax.f32 %v1550_v14, 0.0 }
 0x376   : > { %v2104_v16 = vpack.c.bf16 %v1566_v15, %v1565_v46 }
 0x378   : > { %2112 = vst [vmem:[%s2952_s29 + $0x38] sm:$0xff] %v2104_v16  }
 0x379   : > { %2269 = shalt.err (!%p2266_p2)
}
 0x37a   : > { %s2346_s8 = smov 4  }
 0x37b   : > { %2127 = dma.vmem_to_hbm [thread:$0]  (%p2457_p9), %s1616_s9, 1024, %s1618_s16, %s1600_s14, %s2345_s18, %s2345_s18, %s2346_s8  }
 0x37c PF: > { %s3065_s29 = sld [smem:[#allocation9_spill]]  ;;  %p2138_p4 = scmp.ge.s32.totalorder %s2340_s12, 2 }
 0x37e   : > { %p2134_p3 = pnand %p2138_p4, %p2463_p12 }
 0x380   : > { %p2135_p5 = pneg %p2134_p3 }
 0x382   : > { %s1632_s25 = sand.u32 1, %s3065_s29  }
 0x383   : > { %s1633_s26 = scalar_lea.sflag [#allocation5], %s1632_s25 }
 0x384   : > { %2307 = dma.done.wait (%p2135_p5), %s1633_s26, 1024  }
 0x385   : > { %2309 = vsyncadd (%p2135_p5), %s1633_s26, 4294966272  ;;  %s24_s12 = sadd.s32 1, %s2340_s12   ;;  %s3067_s20 = sld [smem:[#allocation10_spill]] }
 0x386   : > { %p21_p6 = scmp.ge.s32.totalorder %s24_s12, 6   ;;  %s3068_s29 = sld [smem:[#allocation15_spill]] }
 0x387   : > { %s3069_s18 = sld [smem:[#allocation11_spill]]  ;;  %s3071_s27 = smov %s2316_s28 }
 0x388   : > { %s3070_s16 = sld [smem:[#allocation12_spill]]  ;;  %s3073_s30 = smov %s2332_s10 }
 0x389   : > { %s3074_s9 = smov %s2336_s11 }
 0x38a   :  { %23 = sbr.rel (!%p21_p6) target bundleno = 9 (0x9), region = 102 }
 0x38b   : > { %s3072_s28 = smov %s3067_s20 }
 0x38d   : > { %s3075_s10 = smov %s3069_s18 }
 0x38e   : > { %s3076_s11 = smov %s3070_s16 }
 0x38f   :  { %1639 = vsyncpa [#allocation4], 1 }
 0x390   :  { %1641 = vsyncpa [#allocation4 + $0x1], 1 }
 0x391   :  { %1642 = vsyncpa [#allocation5], 1 }
 0x392   :  { %1644 = vsyncpa [#allocation5 + $0x1], 1 }

</bundles_post_ra>
